<compile_context>
chip_gen: v7x
topology: tpu7x:2x2x1
jax: 0.10.0
libtpu: 0.0.40
codegen_flags: <defaults>
</compile_context>

<pallas_src>
import functools

import jax
import jax.numpy as jnp
from jax.experimental import pallas as pl
from jax.experimental.pallas import tpu as pltpu

_BATCH_ALIGN = 16  # bf16-friendly sublane alignment for batch tiles


def _round_up(x, m):
    return (x + m - 1) // m * m


def _dqn_kernel(x_ref, w1_ref, b1_ref, w2_ref, b2_ref, w3_ref, b3_ref,
                o_ref, acc_ref):
    """Grid = (batch tiles i [parallel], feature-reduction tiles k [arbitrary]).

    Layer 1 (x @ W1) is accumulated across the feature axis into a f32 VMEM
    scratch initialized with the bias; on the last K step the ReLU and layers
    2-3 run fully fused (intermediate activations never touch HBM).
    """
    k = pl.program_id(1)

    @pl.when(k == 0)
    def _():
        acc_ref[...] = jnp.broadcast_to(b1_ref[...], acc_ref.shape)

    # Partial product of layer 1 for this feature tile (bf16 MXU, f32 accum).
    acc_ref[...] += jnp.dot(x_ref[...], w1_ref[...],
                            preferred_element_type=jnp.float32)

    @pl.when(k == pl.num_programs(1) - 1)
    def _():
        h1 = jnp.maximum(acc_ref[...], 0.0).astype(w2_ref.dtype)
        h2 = jnp.dot(h1, w2_ref[...],
                     preferred_element_type=jnp.float32) + b2_ref[...]
        h2 = jnp.maximum(h2, 0.0).astype(w3_ref.dtype)
        o_ref[...] = jnp.dot(h2, w3_ref[...],
                             preferred_element_type=jnp.float32) + b3_ref[...]


def prepare_params(params, k_tile=2048):
    """One-time (outside jit) padding + bf16 cast of the Linear parameters.

    * W1 rows (flattened-feature axis) are zero-padded to a multiple of the K
      reduction tile so no per-call jnp.pad of the (possibly tens-of-MB) W1 is
      needed inside the jitted forward.
    * W3 / b3 columns are zero-padded to a multiple of 128 for lane-dense
      output stores; the wrapper slices the padding off.
    * Weights are cast to bf16 (native MXU dtype, halves the W1 HBM stream);
      biases stay f32 and are reshaped to (1, N) rows for in-kernel broadcast.
    """
    assert k_tile % 256 == 0, "k_tile must be a multiple of 256"
    w1, b1, w2, b2, w3, b3 = params
    F, H1 = w1.shape
    H2 = w2.shape[1]
    A = w3.shape[1]

    tk = min(k_tile, _round_up(F, 256))
    Fp = _round_up(F, tk)
    Ap = _round_up(A, 128)

    w1p = jnp.pad(w1, ((0, Fp - F), (0, 0))).astype(jnp.bfloat16)
    w3p = jnp.pad(w3, ((0, 0), (0, Ap - A))).astype(jnp.bfloat16)
    b3p = jnp.pad(b3, ((0, Ap - A),))

    return (w1p,
            b1.astype(jnp.float32).reshape(1, H1),
            w2.astype(jnp.bfloat16),
            b2.astype(jnp.float32).reshape(1, H2),
            w3p,
            b3p.astype(jnp.float32).reshape(1, Ap))


@functools.partial(jax.jit,
                   static_argnames=("n_actions", "batch_tile", "k_tile"))
def dqn_forward(x, prepared, n_actions, batch_tile=256, k_tile=2048):
    """x: (B, C, H, W); prepared: output of prepare_params (same k_tile).

    Returns (B, n_actions) float32 Q-values.
    batch_tile: 256 fills the 256-wide MXU M dim on v6e/v7x; use 128 on v5e.
    k_tile:     feature-reduction tile, multiple of 256.
    """
    w1, b1, w2, b2, w3, b3 = prepared
    B = x.shape[0]
    x = x.reshape(B, -1)                          # torch.flatten(start_dim=1)
    F = x.shape[1]
    Fp, H1 = w1.shape
    H2 = w2.shape[1]
    Ap = w3.shape[1]
    assert Fp >= F and n_actions <= Ap

    # bf16 datapath for the dominant (x, W1) streams; accumulation stays f32.
    x = x.astype(jnp.bfloat16)

    # --- batch tiling ---------------------------------------------------
    Br = _round_up(B, _BATCH_ALIGN)
    if Br <= _BATCH_ALIGN:
        bt = Br
    else:
        # >= 2 parallel batch tiles (keeps both v7x TensorCores busy) but as
        # few as possible: every extra batch tile re-streams all of W1.
        n_tiles = max(2, -(-Br // batch_tile))
        bt = _round_up(-(-Br // n_tiles), _BATCH_ALIGN)
    Bp = _round_up(Br, bt)

    # --- reduction tiling (matches the padding done in prepare_params) ---
    tk = min(k_tile, Fp)
    assert Fp % tk == 0, "prepare_params and dqn_forward must use the same k_tile"

    pad_b, pad_f = Bp - B, Fp - F
    if pad_b or pad_f:
        x = jnp.pad(x, ((0, pad_b), (0, pad_f)))  # zero rows/features -> no-op

    grid = (Bp // bt, Fp // tk)
    n_btiles = grid[0]

    # Advisory cost hint (W1 is re-streamed once per batch tile).
    flops = 2 * Bp * (Fp * H1 + H1 * H2 + H2 * Ap)
    bytes_accessed = (
        Bp * Fp * 2                               # x (bf16), read once
        + n_btiles * Fp * H1 * 2                  # W1 (bf16), per batch tile
        + (H1 * H2 + H2 * Ap) * 2                 # W2, W3 (resident)
        + (H1 + H2 + Ap) * 4                      # biases (f32)
        + Bp * Ap * 4)                            # output (f32)

    # Tight VMEM budget: double-buffered streaming tiles + resident weights +
    # the f32 layer-1 accumulator (documents v7x 64 MiB safety).
    vmem_bytes = (2 * (bt * tk * 2 + tk * H1 * 2 + bt * Ap * 4)
                  + 2 * (H1 * 4 + H1 * H2 * 2 + H2 * 4 + H2 * Ap * 2 + Ap * 4)
                  + bt * H1 * 4)
    vmem_limit = min(max(2 * vmem_bytes, 16 << 20), 60 << 20)

    out = pl.pallas_call(
        _dqn_kernel,
        out_shape=jax.ShapeDtypeStruct((Bp, Ap), jnp.float32),
        grid=grid,
        in_specs=[
            pl.BlockSpec((bt, tk), lambda i, k: (i, k)),   # x tile (batch, K)
            pl.BlockSpec((tk, H1), lambda i, k: (k, 0)),   # W1 K-tile
            pl.BlockSpec((1, H1), lambda i, k: (0, 0)),    # b1 (resident)
            pl.BlockSpec((H1, H2), lambda i, k: (0, 0)),   # W2 (resident)
            pl.BlockSpec((1, H2), lambda i, k: (0, 0)),    # b2
            pl.BlockSpec((H2, Ap), lambda i, k: (0, 0)),   # W3 (resident, padded)
            pl.BlockSpec((1, Ap), lambda i, k: (0, 0)),    # b3 (padded)
        ],
        out_specs=pl.BlockSpec((bt, Ap), lambda i, k: (i, 0)),  # lane-dense
        scratch_shapes=[pltpu.VMEM((bt, H1), jnp.float32)],     # layer-1 acc
        compiler_params=pltpu.CompilerParams(
            dimension_semantics=("parallel", "arbitrary"),
            vmem_limit_bytes=vmem_limit,
        ),
        cost_estimate=pl.CostEstimate(
            flops=flops, transcendentals=0, bytes_accessed=bytes_accessed),
    )(x, w1, b1, w2, b2, w3, b3)

    return out[:B, :n_actions]


def init_dqn_params(key, obs_shape, n_actions):
    """Deterministic synthetic parameters matching nn.Linear shapes (f32).

    Weights stored as (in_features, out_features) == W_torch.T.
    """
    flat_dim = 1
    for d in obs_shape:
        flat_dim *= d
    dims = [flat_dim, 512, 256, n_actions]
    keys = jax.random.split(key, 6)
    params = []
    for li in range(3):
        fan_in, fan_out = dims[li], dims[li + 1]
        bound = 1.0 / jnp.sqrt(jnp.float32(fan_in))  # torch Linear default-style
        w = jax.random.uniform(keys[2 * li], (fan_in, fan_out),
                               jnp.float32, -bound, bound)
        b = jax.random.uniform(keys[2 * li + 1], (fan_out,),
                               jnp.float32, -bound, bound)
        params.extend([w, b])
    return tuple(params)


def dqn_reference(x, params):
    """Pure-JAX f32 reference of the same forward pass."""
    w1, b1, w2, b2, w3, b3 = params
    x = x.astype(jnp.float32).reshape(x.shape[0], -1)
    h1 = jnp.maximum(x @ w1 + b1, 0.0)
    h2 = jnp.maximum(h1 @ w2 + b2, 0.0)
    return h2 @ w3 + b3


if __name__ == "__main__":
    key = jax.random.PRNGKey(0)
    k_x, k_p = jax.random.split(key)

    obs_shape = (4, 16, 16)      # C, H, W  -> flat_dim = 1024
    n_actions = 8
    batch = 2

    x = jax.random.normal(k_x, (batch,) + obs_shape, dtype=jnp.float32)
    params = init_dqn_params(k_p, obs_shape, n_actions)
    prepared = prepare_params(params)            # one-time pad + bf16 cast

    out = dqn_forward(x, prepared, n_actions)
    out = jax.block_until_ready(out)

    ref = dqn_reference(x, params)
    assert out.shape == (batch, n_actions), out.shape
    # bf16 datapath (f32 accumulation) vs. the f32 XLA reference.
    max_err = float(jnp.max(jnp.abs(out - ref)))
    assert jnp.allclose(out, ref, atol=2e-2, rtol=2e-2), max_err

    print("KERNEL_OK")
</pallas_src>

<mosaic_0001>
module attributes {stable_mosaic.version = 11 : i64} {
  func.func @_dqn_kernel(%arg0: i32, %arg1: i32, %arg2: memref<16x1024xbf16, #tpu.memory_space<vmem>>, %arg3: memref<1024x512xbf16, #tpu.memory_space<vmem>>, %arg4: memref<1x512xf32, #tpu.memory_space<vmem>>, %arg5: memref<512x256xbf16, #tpu.memory_space<vmem>>, %arg6: memref<1x256xf32, #tpu.memory_space<vmem>>, %arg7: memref<256x128xbf16, #tpu.memory_space<vmem>>, %arg8: memref<1x128xf32, #tpu.memory_space<vmem>>, %arg9: memref<16x128xf32, #tpu.memory_space<vmem>>, %arg10: memref<16x512xf32, #tpu.memory_space<vmem>>) attributes {dimension_semantics = [#tpu.dimension_semantics<parallel>, #tpu.dimension_semantics<arbitrary>], iteration_bounds = array<i64: 1, 1>, scalar_prefetch = 0 : i64, scratch_operands = 1 : i64, tpu.core_type = #tpu.core_type<tc>, window_params = [{transform_indices = @transform_0, window_bounds = array<i64: 16, 1024>}, {transform_indices = @transform_1, window_bounds = array<i64: 1024, 512>}, {pipeline_mode = #tpu.pipeline_mode<synchronous>, transform_indices = @transform_2, window_bounds = array<i64: 1, 512>}, {pipeline_mode = #tpu.pipeline_mode<synchronous>, transform_indices = @transform_3, window_bounds = array<i64: 512, 256>}, {pipeline_mode = #tpu.pipeline_mode<synchronous>, transform_indices = @transform_4, window_bounds = array<i64: 1, 256>}, {pipeline_mode = #tpu.pipeline_mode<synchronous>, transform_indices = @transform_5, window_bounds = array<i64: 256, 128>}, {pipeline_mode = #tpu.pipeline_mode<synchronous>, transform_indices = @transform_6, window_bounds = array<i64: 1, 128>}, {transform_indices = @transform_7, window_bounds = array<i64: 16, 128>}]} {
    %c0_i32 = arith.constant 0 : i32
    %0 = arith.cmpi eq, %arg1, %c0_i32 : i32
    %1 = arith.extui %0 : i1 to i32
    %c0_i32_0 = arith.constant 0 : i32
    %2 = arith.cmpi ne, %1, %c0_i32_0 : i32
    scf.if %2 {
      %c0_10 = arith.constant 0 : index
      %c0_11 = arith.constant 0 : index
      %12 = vector.load %arg4[%c0_10, %c0_11] : memref<1x512xf32, #tpu.memory_space<vmem>>, vector<1x512xf32>
      %13 = vector.shape_cast %12 : vector<1x512xf32> to vector<1x512xf32>
      %14 = vector.broadcast %13 : vector<1x512xf32> to vector<16x512xf32>
      %c0_12 = arith.constant 0 : index
      %c0_13 = arith.constant 0 : index
      %15 = vector.load %arg10[%c0_12, %c0_13] : memref<16x512xf32, #tpu.memory_space<vmem>>, vector<16x512xf32>
      tpu.vector_store %arg10[%c0_12, %c0_13], %14 {strides = array<i32>} : memref<16x512xf32, #tpu.memory_space<vmem>>, vector<16x512xf32>,
    } else {
    }
    %c0 = arith.constant 0 : index
    %c0_1 = arith.constant 0 : index
    %3 = vector.load %arg10[%c0, %c0_1] : memref<16x512xf32, #tpu.memory_space<vmem>>, vector<16x512xf32>
    %c0_2 = arith.constant 0 : index
    %c0_3 = arith.constant 0 : index
    %4 = vector.load %arg2[%c0_2, %c0_3] : memref<16x1024xbf16, #tpu.memory_space<vmem>>, vector<16x1024xbf16>
    %c0_4 = arith.constant 0 : index
    %c0_5 = arith.constant 0 : index
    %5 = vector.load %arg3[%c0_4, %c0_5] : memref<1024x512xbf16, #tpu.memory_space<vmem>>, vector<1024x512xbf16>
    %cst = arith.constant dense<0.000000e+00> : vector<16x512xf32>
    %6 = tpu.matmul %4, %5, %cst {dimension_numbers = #tpu.dot_dimension_numbers<[1], [0], [0], [1], [0, 0, 1, 1], [], []>} : vector<16x1024xbf16>, vector<1024x512xbf16>, vector<16x512xf32> -> vector<16x512xf32>
    %7 = arith.addf %3, %6 : vector<16x512xf32>
    %c0_6 = arith.constant 0 : index
    %c0_7 = arith.constant 0 : index
    %8 = vector.load %arg10[%c0_6, %c0_7] : memref<16x512xf32, #tpu.memory_space<vmem>>, vector<16x512xf32>
    tpu.vector_store %arg10[%c0_6, %c0_7], %7 {strides = array<i32>} : memref<16x512xf32, #tpu.memory_space<vmem>>, vector<16x512xf32>,
    %c0_i32_8 = arith.constant 0 : i32
    %9 = arith.cmpi eq, %arg1, %c0_i32_8 : i32
    %10 = arith.extui %9 : i1 to i32
    %c0_i32_9 = arith.constant 0 : i32
    %11 = arith.cmpi ne, %10, %c0_i32_9 : i32
    scf.if %11 {
      %c0_10 = arith.constant 0 : index
      %c0_11 = arith.constant 0 : index
      %12 = vector.load %arg10[%c0_10, %c0_11] : memref<16x512xf32, #tpu.memory_space<vmem>>, vector<16x512xf32>
      %cst_12 = arith.constant 0.000000e+00 : f32
      %13 = vector.broadcast %cst_12 : f32 to vector<16x512xf32>
      %14 = arith.maximumf %12, %13 : vector<16x512xf32>
      %15 = arith.truncf %14 : vector<16x512xf32> to vector<16x512xbf16>
      %c0_13 = arith.constant 0 : index
      %c0_14 = arith.constant 0 : index
      %16 = vector.load %arg5[%c0_13, %c0_14] : memref<512x256xbf16, #tpu.memory_space<vmem>>, vector<512x256xbf16>
      %cst_15 = arith.constant dense<0.000000e+00> : vector<16x256xf32>
      %17 = tpu.matmul %15, %16, %cst_15 {dimension_numbers = #tpu.dot_dimension_numbers<[1], [0], [0], [1], [0, 0, 1, 1], [], []>} : vector<16x512xbf16>, vector<512x256xbf16>, vector<16x256xf32> -> vector<16x256xf32>
      %c0_16 = arith.constant 0 : index
      %c0_17 = arith.constant 0 : index
      %18 = vector.load %arg6[%c0_16, %c0_17] : memref<1x256xf32, #tpu.memory_space<vmem>>, vector<1x256xf32>
      %19 = vector.broadcast %18 : vector<1x256xf32> to vector<16x256xf32>
      %20 = arith.addf %17, %19 : vector<16x256xf32>
      %cst_18 = arith.constant 0.000000e+00 : f32
      %21 = vector.broadcast %cst_18 : f32 to vector<16x256xf32>
      %22 = arith.maximumf %20, %21 : vector<16x256xf32>
      %23 = arith.truncf %22 : vector<16x256xf32> to vector<16x256xbf16>
      %c0_19 = arith.constant 0 : index
      %c0_20 = arith.constant 0 : index
      %24 = vector.load %arg7[%c0_19, %c0_20] : memref<256x128xbf16, #tpu.memory_space<vmem>>, vector<256x128xbf16>
      %cst_21 = arith.constant dense<0.000000e+00> : vector<16x128xf32>
      %25 = tpu.matmul %23, %24, %cst_21 {dimension_numbers = #tpu.dot_dimension_numbers<[1], [0], [0], [1], [0, 0, 1, 1], [], []>} : vector<16x256xbf16>, vector<256x128xbf16>, vector<16x128xf32> -> vector<16x128xf32>
      %c0_22 = arith.constant 0 : index
      %c0_23 = arith.constant 0 : index
      %26 = vector.load %arg8[%c0_22, %c0_23] : memref<1x128xf32, #tpu.memory_space<vmem>>, vector<1x128xf32>
      %27 = vector.broadcast %26 : vector<1x128xf32> to vector<16x128xf32>
      %28 = arith.addf %25, %27 : vector<16x128xf32>
      %c0_24 = arith.constant 0 : index
      %c0_25 = arith.constant 0 : index
      %29 = vector.load %arg9[%c0_24, %c0_25] : memref<16x128xf32, #tpu.memory_space<vmem>>, vector<16x128xf32>
      tpu.vector_store %arg9[%c0_24, %c0_25], %28 {strides = array<i32>} : memref<16x128xf32, #tpu.memory_space<vmem>>, vector<16x128xf32>,
    } else {
    }
    return
  }
  func.func @transform_0(%arg0: i32, %arg1: i32) -> (i32, i32) {
    %c0_i32 = arith.constant 0 : i32
    return %arg0, %arg1 : i32, i32
  }
  func.func @transform_1(%arg0: i32, %arg1: i32) -> (i32, i32) {
    %c0_i32 = arith.constant 0 : i32
    %c0_i32_0 = arith.constant 0 : i32
    return %arg1, %c0_i32 : i32, i32
  }
  func.func @transform_2(%arg0: i32, %arg1: i32) -> (i32, i32) {
    %c0_i32 = arith.constant 0 : i32
    %c0_i32_0 = arith.constant 0 : i32
    %c0_i32_1 = arith.constant 0 : i32
    return %c0_i32, %c0_i32_0 : i32, i32
  }
  func.func @transform_3(%arg0: i32, %arg1: i32) -> (i32, i32) {
    %c0_i32 = arith.constant 0 : i32
    %c0_i32_0 = arith.constant 0 : i32
    %c0_i32_1 = arith.constant 0 : i32
    return %c0_i32, %c0_i32_0 : i32, i32
  }
  func.func @transform_4(%arg0: i32, %arg1: i32) -> (i32, i32) {
    %c0_i32 = arith.constant 0 : i32
    %c0_i32_0 = arith.constant 0 : i32
    %c0_i32_1 = arith.constant 0 : i32
    return %c0_i32, %c0_i32_0 : i32, i32
  }
  func.func @transform_5(%arg0: i32, %arg1: i32) -> (i32, i32) {
    %c0_i32 = arith.constant 0 : i32
    %c0_i32_0 = arith.constant 0 : i32
    %c0_i32_1 = arith.constant 0 : i32
    return %c0_i32, %c0_i32_0 : i32, i32
  }
  func.func @transform_6(%arg0: i32, %arg1: i32) -> (i32, i32) {
    %c0_i32 = arith.constant 0 : i32
    %c0_i32_0 = arith.constant 0 : i32
    %c0_i32_1 = arith.constant 0 : i32
    return %c0_i32, %c0_i32_0 : i32, i32
  }
  func.func @transform_7(%arg0: i32, %arg1: i32) -> (i32, i32) {
    %c0_i32 = arith.constant 0 : i32
    %c0_i32_0 = arith.constant 0 : i32
    return %arg0, %c0_i32 : i32, i32
  }
}

</mosaic_0001>

<bundles_post_ra>
// kernel: dqn_forward.1
= control target key start
LH: loop header
LB: loop body
LE: loop exit
PB: predicated region body
PF: predicated region fallthrough
CT: control target
= control target key end

     0   :  { %12 = vsyncpa [#allocation4], 0  ;;  %s3918_s0 = inlined_call_operand.vmem [shape: bf16[16,1024], index: 0, kind: input, shape index: {}]   ;;  %s3919_s1 = inlined_call_operand.hbm [shape: bf16[1024,512], index: 1, kind: input, shape index: {}]   ;;  %s3920_s2 = inlined_call_operand.vmem [shape: f32[1,512], index: 2, kind: input, shape index: {}]   ;;  %s3921_s3 = inlined_call_operand.hbm [shape: bf16[512,256], index: 3, kind: input, shape index: {}]   ;;  %s3922_s4 = inlined_call_operand.vmem [shape: f32[1,256], index: 4, kind: input, shape index: {}]   ;;  %s3923_s5 = inlined_call_operand.vmem [shape: bf16[256,128], index: 5, kind: input, shape index: {}]   ;;  %s3924_s6 = inlined_call_operand.vmem [shape: f32[1,128], index: 6, kind: input, shape index: {}]   ;;  %s3925_s7 = inlined_call_operand.vmem [shape: f32[16,128], index: 7, kind: output, shape index: {}]  }
   0x1   :  { %13 = vsyncpa [#allocation6], 0  ;;  %s3685_s24 = smov [#allocation3]   ;;  %s3637_s28 = scalar_lea.hbm %s3919_s1, 32768 }
   0x2   :  { %s21_s25 = sshll.u32 %s3685_s24, 4  ;;  %p3638_p0 = scmp.ne.s32.totalorder %s3919_s1, %s3637_s28  ;;  %s22_s25 = int_to_ptr.vmem [resolvable:$true] %s21_s25 }
   0x3   :  { %p3641_p1 = scmp.lt.u32.totalorder %s3637_s28, %s3919_s1 }
   0x5   :  { %p3643_p2 = pnand %p3641_p1, %p3638_p0 }
   0x7   :  { %3646 = shalt.err (!%p3643_p2)
}
   0x8   :  { %s3647_s10 = scalar_lea.vmem %s22_s25, 32768  ;;  %p3652_p4 = scmp.lt.s32.totalorder %s22_s25, %s22_s25 }
   0x9   :  { %p3648_p3 = scmp.ne.s32.totalorder %s22_s25, %s3647_s10  ;;  %p3653_p5 = scmp.lt.s32.totalorder %s3647_s10, %s3647_s10 }
   0xb   :  { %p3654_p6 = por %p3653_p5, %p3652_p4 }
   0xd   :  { %p3655_p7 = pnand %p3654_p6, %p3648_p3 }
   0xf   :  { %3658 = shalt.err (!%p3655_p7)
}
  0x10   :  { %s3686_s11 = smov 256   ;;  %s3687_s12 = smov 16  }
  0x11   :  { %27 = dma.hbm_to_vmem [thread:$0]  %s3919_s1, 32768, %s22_s25, [#allocation4], %s3686_s11, %s3686_s11, %s3687_s12  }
  0x12   :  { %s3688_s15 = smov [#allocation5]   ;;  %s3659_s19 = scalar_lea.hbm %s3921_s3, 8192 }
  0x13   :  { %s35_s16 = sshll.u32 %s3688_s15, 4  ;;  %p3660_p8 = scmp.ne.s32.totalorder %s3921_s3, %s3659_s19  ;;  %s36_s16 = int_to_ptr.vmem [resolvable:$true] %s35_s16 }
  0x14   :  { %p3663_p9 = scmp.lt.u32.totalorder %s3659_s19, %s3921_s3 }
  0x16   :  { %p3665_p10 = pnand %p3663_p9, %p3660_p8 }
  0x18   :  { %3668 = shalt.err (!%p3665_p10)
}
  0x19   :  { %s3669_s24 = scalar_lea.vmem %s36_s16, 8192  ;;  %p3674_p12 = scmp.lt.s32.totalorder %s36_s16, %s36_s16 }
  0x1a   :  { %p3670_p11 = scmp.ne.s32.totalorder %s36_s16, %s3669_s24  ;;  %p3675_p13 = scmp.lt.s32.totalorder %s3669_s24, %s3669_s24 }
  0x1c   :  { %p3676_p0 = por %p3675_p13, %p3674_p12 }
  0x1e   :  { %p3677_p1 = pnand %p3676_p0, %p3670_p11 }
  0x20   :  { %3680 = shalt.err (!%p3677_p1)
}
  0x21   :  { %s3689_s1 = smov 128   ;;  %s3690_s25 = smov 8  }
  0x22   :  { %41 = dma.hbm_to_vmem [thread:$0]  %s3921_s3, 8192, %s36_s16, [#allocation6], %s3689_s1, %s3689_s1, %s3690_s25  }
  0x23   :  { %3681 = dma.done.wait [#allocation4], 32768  }
  0x24   :  { %3682 = vsyncadd [#allocation4], 4294934528 }
  0x25   :  { %3683 = dma.done.wait [#allocation6], 8192  }
  0x26   :  { %3684 = vsyncadd [#allocation6], 4294959104  ;;  %v3141_v0 = vld [vmem:[#allocation3 + $0x4] ss:$16 sps:$4 sm:$0xff]   ;;  %v3145_v2 = vld [vmem:[#allocation3] ss:$16 sps:$4 sm:$0xff]  }
  0x27   :  { %v3143_v1 = vld [vmem:[#allocation3 + $0x204] ss:$16 sps:$4 sm:$0xff]   ;;  %1681 = vmatprep.subr.bf16.mxu1 %v3141_v0  ;;  %v3146_v3 = vld [vmem:[#allocation3 + $0x200] ss:$16 sps:$4 sm:$0xff]   ;;  %v98_v50 = vld [vmem:[%s3918_s0 + $0x8] sm:$0xff] }
  0x28   :  { %1724 = vmatprep.subr.bf16.mxu0 %v3143_v1  ;;  %v3147_v4 = vld [vmem:[#allocation3 + $0x24] ss:$16 sps:$4 sm:$0xff]   ;;  %1682 = vmatpush1.bf16.msra.mxu1 %v3145_v2  ;;  %v3151_v6 = vld [vmem:[#allocation3 + $0x20] ss:$16 sps:$4 sm:$0xff]   ;;  %v102_v51 = vld [vmem:[%s3918_s0 + $0x28] sm:$0xff] }
  0x29   :  { %1725 = vmatpush1.bf16.msra.mxu0 %v3146_v3  ;;  %v3149_v5 = vld [vmem:[#allocation3 + $0x224] ss:$16 sps:$4 sm:$0xff]   ;;  %1683 = vmatprep.subr.bf16.mxu1 %v3147_v4  ;;  %v3152_v7 = vld [vmem:[#allocation3 + $0x220] ss:$16 sps:$4 sm:$0xff]   ;;  %v3767_v55 = vcombine.high %v98_v50, %v102_v51 }
  0x2a   :  { %1726 = vmatprep.subr.bf16.mxu0 %v3149_v5  ;;  %v3153_v8 = vld [vmem:[#allocation3 + $0x44] ss:$16 sps:$4 sm:$0xff]   ;;  %v3157_v10 = vld [vmem:[#allocation3 + $0x40] ss:$16 sps:$4 sm:$0xff]  }
  0x2b   :  { %v3155_v9 = vld [vmem:[#allocation3 + $0x244] ss:$16 sps:$4 sm:$0xff]   ;;  %v3158_v11 = vld [vmem:[#allocation3 + $0x240] ss:$16 sps:$4 sm:$0xff]   ;;  %1756 = vmatprep.mubr.bf16.mxu0 %v3767_v55 }
  0x2c   :  { %1684 = vmatpush1.bf16.msra.mxu1 %v3151_v6  ;;  %v3159_v12 = vld [vmem:[#allocation3 + $0x64] ss:$16 sps:$4 sm:$0xff]   ;;  %v3163_v14 = vld [vmem:[#allocation3 + $0x60] ss:$16 sps:$4 sm:$0xff]  }
  0x2d   :  { %1727 = vmatpush1.bf16.msra.mxu0 %v3152_v7  ;;  %1685 = vmatprep.subr.bf16.mxu1 %v3153_v8  ;;  %v3161_v13 = vld [vmem:[#allocation3 + $0x264] ss:$16 sps:$4 sm:$0xff]   ;;  %v3164_v15 = vld [vmem:[#allocation3 + $0x260] ss:$16 sps:$4 sm:$0xff]   ;;  %v3242_v7 = vld [vmem:[#allocation3 + $0xc] ss:$16 sps:$4 sm:$0xff]  }
  0x2e   :  { %1728 = vmatprep.subr.bf16.mxu0 %v3155_v9  ;;  %v3165_v16 = vld [vmem:[#allocation3 + $0x84] ss:$16 sps:$4 sm:$0xff]   ;;  %v3169_v18 = vld [vmem:[#allocation3 + $0x80] ss:$16 sps:$4 sm:$0xff]   ;;  %v3772_v9 = vcombine.low %v98_v50, %v102_v51  ;;  %v3294_v50 = vld [vmem:[#allocation3 + $0x128] ss:$16 sps:$4 sm:$0xff]  }
  0x2f   :  { %v3167_v17 = vld [vmem:[#allocation3 + $0x284] ss:$16 sps:$4 sm:$0xff]   ;;  %v3170_v19 = vld [vmem:[#allocation3 + $0x280] ss:$16 sps:$4 sm:$0xff]  }
  0x30   :  { %1686 = vmatpush1.bf16.msra.mxu1 %v3157_v10  ;;  %v3171_v20 = vld [vmem:[#allocation3 + $0xa4] ss:$16 sps:$4 sm:$0xff]   ;;  %v3175_v22 = vld [vmem:[#allocation3 + $0xa0] ss:$16 sps:$4 sm:$0xff]  }
  0x31   :  { %1729 = vmatpush1.bf16.msra.mxu0 %v3158_v11  ;;  %1687 = vmatprep.subr.bf16.mxu1 %v3159_v12  ;;  %v3173_v21 = vld [vmem:[#allocation3 + $0x2a4] ss:$16 sps:$4 sm:$0xff]   ;;  %v3176_v23 = vld [vmem:[#allocation3 + $0x2a0] ss:$16 sps:$4 sm:$0xff]   ;;  %v3240_v11 = vld [vmem:[#allocation3 + $0x8] ss:$16 sps:$4 sm:$0xff]  }
  0x32   :  { %1730 = vmatprep.subr.bf16.mxu0 %v3161_v13  ;;  %v3177_v24 = vld [vmem:[#allocation3 + $0xc4] ss:$16 sps:$4 sm:$0xff]   ;;  %v3181_v26 = vld [vmem:[#allocation3 + $0xc0] ss:$16 sps:$4 sm:$0xff]   ;;  %v3248_v13 = vld [vmem:[#allocation3 + $0x2c] ss:$16 sps:$4 sm:$0xff]  }
  0x33   :  { %v3179_v25 = vld [vmem:[#allocation3 + $0x2c4] ss:$16 sps:$4 sm:$0xff]   ;;  %v3182_v27 = vld [vmem:[#allocation3 + $0x2c0] ss:$16 sps:$4 sm:$0xff]  }
  0x34   :  { %1688 = vmatpush1.bf16.msra.mxu1 %v3163_v14  ;;  %v3183_v28 = vld [vmem:[#allocation3 + $0xe4] ss:$16 sps:$4 sm:$0xff]   ;;  %v3187_v30 = vld [vmem:[#allocation3 + $0xe0] ss:$16 sps:$4 sm:$0xff]  }
  0x35   :  { %1731 = vmatpush1.bf16.msra.mxu0 %v3164_v15  ;;  %1689 = vmatprep.subr.bf16.mxu1 %v3165_v16  ;;  %v3185_v29 = vld [vmem:[#allocation3 + $0x2e4] ss:$16 sps:$4 sm:$0xff]   ;;  %v3188_v31 = vld [vmem:[#allocation3 + $0x2e0] ss:$16 sps:$4 sm:$0xff]   ;;  %v3246_v15 = vld [vmem:[#allocation3 + $0x28] ss:$16 sps:$4 sm:$0xff]  }
  0x36   :  { %1732 = vmatprep.subr.bf16.mxu0 %v3167_v17  ;;  %v3189_v32 = vld [vmem:[#allocation3 + $0x104] ss:$16 sps:$4 sm:$0xff]   ;;  %v3193_v34 = vld [vmem:[#allocation3 + $0x100] ss:$16 sps:$4 sm:$0xff]   ;;  %v3254_v17 = vld [vmem:[#allocation3 + $0x4c] ss:$16 sps:$4 sm:$0xff]  }
  0x37   :  { %v3191_v33 = vld [vmem:[#allocation3 + $0x304] ss:$16 sps:$4 sm:$0xff]   ;;  %v3194_v35 = vld [vmem:[#allocation3 + $0x300] ss:$16 sps:$4 sm:$0xff]  }
  0x38   :  { %1690 = vmatpush1.bf16.msra.mxu1 %v3169_v18  ;;  %v3195_v36 = vld [vmem:[#allocation3 + $0x124] ss:$16 sps:$4 sm:$0xff]   ;;  %v3199_v38 = vld [vmem:[#allocation3 + $0x120] ss:$16 sps:$4 sm:$0xff]  }
  0x39   :  { %1733 = vmatpush1.bf16.msra.mxu0 %v3170_v19  ;;  %1691 = vmatprep.subr.bf16.mxu1 %v3171_v20  ;;  %v3197_v37 = vld [vmem:[#allocation3 + $0x324] ss:$16 sps:$4 sm:$0xff]   ;;  %v3200_v39 = vld [vmem:[#allocation3 + $0x320] ss:$16 sps:$4 sm:$0xff]   ;;  %v3252_v19 = vld [vmem:[#allocation3 + $0x48] ss:$16 sps:$4 sm:$0xff]  }
  0x3a   :  { %1734 = vmatprep.subr.bf16.mxu0 %v3173_v21  ;;  %v3201_v40 = vld [vmem:[#allocation3 + $0x144] ss:$16 sps:$4 sm:$0xff]   ;;  %v3205_v42 = vld [vmem:[#allocation3 + $0x140] ss:$16 sps:$4 sm:$0xff]   ;;  %v3260_v21 = vld [vmem:[#allocation3 + $0x6c] ss:$16 sps:$4 sm:$0xff]  }
  0x3b   :  { %v3203_v41 = vld [vmem:[#allocation3 + $0x344] ss:$16 sps:$4 sm:$0xff]   ;;  %v3206_v43 = vld [vmem:[#allocation3 + $0x340] ss:$16 sps:$4 sm:$0xff]  }
  0x3c   :  { %1692 = vmatpush1.bf16.msra.mxu1 %v3175_v22  ;;  %v3207_v44 = vld [vmem:[#allocation3 + $0x164] ss:$16 sps:$4 sm:$0xff]   ;;  %v3211_v46 = vld [vmem:[#allocation3 + $0x160] ss:$16 sps:$4 sm:$0xff]  }
  0x3d   :  { %1735 = vmatpush1.bf16.msra.mxu0 %v3176_v23  ;;  %1693 = vmatprep.subr.bf16.mxu1 %v3177_v24  ;;  %v3209_v45 = vld [vmem:[#allocation3 + $0x364] ss:$16 sps:$4 sm:$0xff]   ;;  %v3212_v47 = vld [vmem:[#allocation3 + $0x360] ss:$16 sps:$4 sm:$0xff]   ;;  %v3258_v23 = vld [vmem:[#allocation3 + $0x68] ss:$16 sps:$4 sm:$0xff]  }
  0x3e   :  { %1736 = vmatprep.subr.bf16.mxu0 %v3179_v25  ;;  %v97_v48 = vld [vmem:[%s3918_s0] sm:$0xff]  ;;  %v3266_v25 = vld [vmem:[#allocation3 + $0x8c] ss:$16 sps:$4 sm:$0xff]  }
  0x3f   :  { %v101_v49 = vld [vmem:[%s3918_s0 + $0x20] sm:$0xff] }
  0x40   :  { %1694 = vmatpush1.bf16.msra.mxu1 %v3181_v26  ;;  %v3213_v52 = vld [vmem:[#allocation3 + $0x184] ss:$16 sps:$4 sm:$0xff]   ;;  %v2737_v53 = vcombine.high %v97_v48, %v101_v49  ;;  %v3217_v56 = vld [vmem:[#allocation3 + $0x180] ss:$16 sps:$4 sm:$0xff]   ;;  %v3770_v8 = vcombine.low %v97_v48, %v101_v49  ;;  %v3296_v48 = vld [vmem:[#allocation3 + $0x12c] ss:$16 sps:$4 sm:$0xff]  }
  0x41   :  { %1737 = vmatpush1.bf16.msra.mxu0 %v3182_v27  ;;  %1695 = vmatprep.subr.bf16.mxu1 %v3183_v28  ;;  %v3215_v54 = vld [vmem:[#allocation3 + $0x384] ss:$16 sps:$4 sm:$0xff]   ;;  %v3218_v57 = vld [vmem:[#allocation3 + $0x380] ss:$16 sps:$4 sm:$0xff]   ;;  %v3264_v27 = vld [vmem:[#allocation3 + $0x88] ss:$16 sps:$4 sm:$0xff]  }
  0x42   :  { %1738 = vmatprep.subr.bf16.mxu0 %v3185_v29  ;;  %1713 = vmatprep.mubr.bf16.mxu1 %v2737_v53  ;;  %v3219_v58 = vld [vmem:[#allocation3 + $0x1a4] ss:$16 sps:$4 sm:$0xff]   ;;  %v3223_v60 = vld [vmem:[#allocation3 + $0x1a0] ss:$16 sps:$4 sm:$0xff]   ;;  %v3272_v29 = vld [vmem:[#allocation3 + $0xac] ss:$16 sps:$4 sm:$0xff]  }
  0x43   :  { %v3221_v59 = vld [vmem:[#allocation3 + $0x3a4] ss:$16 sps:$4 sm:$0xff]   ;;  %v3224_v61 = vld [vmem:[#allocation3 + $0x3a0] ss:$16 sps:$4 sm:$0xff]  }
  0x44   :  { %1696 = vmatpush1.bf16.msra.mxu1 %v3187_v30  ;;  %v3225_v62 = vld [vmem:[#allocation3 + $0x1c4] ss:$16 sps:$4 sm:$0xff]   ;;  %v3229_v0 = vld [vmem:[#allocation3 + $0x1c0] ss:$16 sps:$4 sm:$0xff]  }
  0x45   :  { %1739 = vmatpush1.bf16.msra.mxu0 %v3188_v31  ;;  %1697 = vmatprep.subr.bf16.mxu1 %v3189_v32  ;;  %v3227_v63 = vld [vmem:[#allocation3 + $0x3c4] ss:$16 sps:$4 sm:$0xff]   ;;  %v3230_v1 = vld [vmem:[#allocation3 + $0x3c0] ss:$16 sps:$4 sm:$0xff]   ;;  %v3270_v31 = vld [vmem:[#allocation3 + $0xa8] ss:$16 sps:$4 sm:$0xff]  }
  0x46   :  { %1740 = vmatprep.subr.bf16.mxu0 %v3191_v33  ;;  %v3231_v2 = vld [vmem:[#allocation3 + $0x1e4] ss:$16 sps:$4 sm:$0xff]   ;;  %v3235_v4 = vld [vmem:[#allocation3 + $0x1e0] ss:$16 sps:$4 sm:$0xff]   ;;  %v3278_v33 = vld [vmem:[#allocation3 + $0xcc] ss:$16 sps:$4 sm:$0xff]  }
  0x47   :  { %v3233_v3 = vld [vmem:[#allocation3 + $0x3e4] ss:$16 sps:$4 sm:$0xff]   ;;  %v3236_v5 = vld [vmem:[#allocation3 + $0x3e0] ss:$16 sps:$4 sm:$0xff]  }
  0x48   :  { %1698 = vmatpush1.bf16.msra.mxu1 %v3193_v34  ;;  %v3239_v6 = vld [vmem:[#allocation3 + $0x404] ss:$16 sps:$4 sm:$0xff]   ;;  %v3237_v10 = vld [vmem:[#allocation3 + $0x400] ss:$16 sps:$4 sm:$0xff]  }
  0x49   :  { %1741 = vmatpush1.bf16.msra.mxu0 %v3194_v35  ;;  %1699 = vmatprep.subr.bf16.mxu1 %v3195_v36  ;;  %v3245_v12 = vld [vmem:[#allocation3 + $0x424] ss:$16 sps:$4 sm:$0xff]   ;;  %v3243_v14 = vld [vmem:[#allocation3 + $0x420] ss:$16 sps:$4 sm:$0xff]  }
  0x4a   :  { %1742 = vmatprep.subr.bf16.mxu0 %v3197_v37  ;;  %v3251_v16 = vld [vmem:[#allocation3 + $0x444] ss:$16 sps:$4 sm:$0xff]   ;;  %v3249_v18 = vld [vmem:[#allocation3 + $0x440] ss:$16 sps:$4 sm:$0xff]   ;;  %v3276_v37 = vld [vmem:[#allocation3 + $0xc8] ss:$16 sps:$4 sm:$0xff]  }
  0x4b   :  { %v3257_v20 = vld [vmem:[#allocation3 + $0x464] ss:$16 sps:$4 sm:$0xff]   ;;  %v3255_v22 = vld [vmem:[#allocation3 + $0x460] ss:$16 sps:$4 sm:$0xff]  }
  0x4c   :  { %1700 = vmatpush1.bf16.msra.mxu1 %v3199_v38  ;;  %v3263_v24 = vld [vmem:[#allocation3 + $0x484] ss:$16 sps:$4 sm:$0xff]   ;;  %v3261_v26 = vld [vmem:[#allocation3 + $0x480] ss:$16 sps:$4 sm:$0xff]  }
  0x4d   :  { %1743 = vmatpush1.bf16.msra.mxu0 %v3200_v39  ;;  %1701 = vmatprep.subr.bf16.mxu1 %v3201_v40  ;;  %v3269_v28 = vld [vmem:[#allocation3 + $0x4a4] ss:$16 sps:$4 sm:$0xff]   ;;  %v3267_v30 = vld [vmem:[#allocation3 + $0x4a0] ss:$16 sps:$4 sm:$0xff]   ;;  %v3284_v40 = vld [vmem:[#allocation3 + $0xec] ss:$16 sps:$4 sm:$0xff]  }
  0x4e   :  { %1744 = vmatprep.subr.bf16.mxu0 %v3203_v41  ;;  %v3275_v32 = vld [vmem:[#allocation3 + $0x4c4] ss:$16 sps:$4 sm:$0xff]   ;;  %v3273_v36 = vld [vmem:[#allocation3 + $0x4c0] ss:$16 sps:$4 sm:$0xff]  }
  0x4f   :  { %v3779_v34 = vld [vmem:[%s3918_s0 + $0x10] sm:$0xff] }
  0x50   :  { %1702 = vmatpush1.bf16.msra.mxu1 %v3205_v42  ;;  %v3784_v35 = vld [vmem:[%s3918_s0 + $0x30] sm:$0xff]  ;;  %v3282_v42 = vld [vmem:[#allocation3 + $0xe8] ss:$16 sps:$4 sm:$0xff]  }
  0x51   :  { %1745 = vmatpush1.bf16.msra.mxu0 %v3206_v43  ;;  %1703 = vmatprep.subr.bf16.mxu1 %v3207_v44  ;;  %v3788_v38 = vcombine.high %v3779_v34, %v3784_v35  ;;  %v3281_v39 = vld [vmem:[#allocation3 + $0x4e4] ss:$16 sps:$4 sm:$0xff]   ;;  %v3279_v41 = vld [vmem:[#allocation3 + $0x4e0] ss:$16 sps:$4 sm:$0xff]   ;;  %v3290_v44 = vld [vmem:[#allocation3 + $0x10c] ss:$16 sps:$4 sm:$0xff]  }
  0x52   :  { %1746 = vmatprep.subr.bf16.mxu0 %v3209_v45  ;;  %v3287_v43 = vld [vmem:[#allocation3 + $0x504] ss:$16 sps:$4 sm:$0xff]   ;;  %v3285_v45 = vld [vmem:[#allocation3 + $0x500] ss:$16 sps:$4 sm:$0xff]  }
  0x53   :  { %v3291_v49 = vld [vmem:[#allocation3 + $0x520] ss:$16 sps:$4 sm:$0xff]   ;;  %v3299_v51 = vld [vmem:[#allocation3 + $0x544] ss:$16 sps:$4 sm:$0xff]  }
  0x54   :  { %1704 = vmatpush1.bf16.msra.mxu1 %v3211_v46  ;;  %v3288_v46 = vld [vmem:[#allocation3 + $0x108] ss:$16 sps:$4 sm:$0xff]  }
  0x55   :  { %1747 = vmatpush1.bf16.msra.mxu0 %v3212_v47  ;;  %1705 = vmatprep.subr.bf16.mxu1 %v3213_v52  ;;  %v3293_v47 = vld [vmem:[#allocation3 + $0x524] ss:$16 sps:$4 sm:$0xff]   ;;  %v3302_v52 = vld [vmem:[#allocation3 + $0x14c] ss:$16 sps:$4 sm:$0xff]  }
  0x56   :  { %1748 = vmatprep.subr.bf16.mxu0 %v3215_v54  ;;  %v3300_v54 = vld [vmem:[#allocation3 + $0x148] ss:$16 sps:$4 sm:$0xff]  }
  0x58   :  { %1706 = vmatpush1.bf16.msra.mxu1 %v3217_v56  ;;  %v3305_v56 = vld [vmem:[#allocation3 + $0x564] ss:$16 sps:$4 sm:$0xff]  }
  0x59   :  { %1749 = vmatpush1.bf16.msra.mxu0 %v3218_v57  ;;  %1707 = vmatprep.subr.bf16.mxu1 %v3219_v58  ;;  %v3308_v57 = vld [vmem:[#allocation3 + $0x16c] ss:$16 sps:$4 sm:$0xff]   ;;  %v3303_v58 = vld [vmem:[#allocation3 + $0x560] ss:$16 sps:$4 sm:$0xff]  }
  0x5a   :  { %1750 = vmatprep.subr.bf16.mxu0 %v3221_v59  ;;  %v3306_v59 = vld [vmem:[#allocation3 + $0x168] ss:$16 sps:$4 sm:$0xff]  }
  0x5c   :  { %1708 = vmatpush1.bf16.msra.mxu1 %v3223_v60  ;;  %v3311_v60 = vld [vmem:[#allocation3 + $0x584] ss:$16 sps:$4 sm:$0xff]  }
  0x5d   :  { %1751 = vmatpush1.bf16.msra.mxu0 %v3224_v61  ;;  %1709 = vmatprep.subr.bf16.mxu1 %v3225_v62  ;;  %v3314_v61 = vld [vmem:[#allocation3 + $0x18c] ss:$16 sps:$4 sm:$0xff]   ;;  %v3309_v62 = vld [vmem:[#allocation3 + $0x580] ss:$16 sps:$4 sm:$0xff]  }
  0x5e   :  { %1752 = vmatprep.subr.bf16.mxu0 %v3227_v63  ;;  %v3312_v63 = vld [vmem:[#allocation3 + $0x188] ss:$16 sps:$4 sm:$0xff]  }
  0x60   :  { %1710 = vmatpush1.bf16.msra.mxu1 %v3229_v0  ;;  %v3317_v0 = vld [vmem:[#allocation3 + $0x5a4] ss:$16 sps:$4 sm:$0xff]  }
  0x61   :  { %1753 = vmatpush1.bf16.msra.mxu0 %v3230_v1  ;;  %1711 = vmatprep.subr.bf16.mxu1 %v3231_v2  ;;  %v3320_v1 = vld [vmem:[#allocation3 + $0x1ac] ss:$16 sps:$4 sm:$0xff]   ;;  %v3315_v2 = vld [vmem:[#allocation3 + $0x5a0] ss:$16 sps:$4 sm:$0xff]  }
  0x62   :  { %1754 = vmatprep.subr.bf16.mxu0 %v3233_v3  ;;  %v3318_v3 = vld [vmem:[#allocation3 + $0x1a8] ss:$16 sps:$4 sm:$0xff]  }
  0x64   :  { %1712 = vmatpush1.bf16.msra.mxu1 %v3235_v4  ;;  %v3323_v4 = vld [vmem:[#allocation3 + $0x5c4] ss:$16 sps:$4 sm:$0xff]  }
  0x65   :  { %1755 = vmatpush1.bf16.msra.mxu0 %v3236_v5  ;;  %1853 = vmatprep.subr.bf16.mxu1 %v3242_v7  ;;  %v3326_v5 = vld [vmem:[#allocation3 + $0x1cc] ss:$16 sps:$4 sm:$0xff]   ;;  %v3324_v7 = vld [vmem:[#allocation3 + $0x1c8] ss:$16 sps:$4 sm:$0xff]  }
  0x66   :  { %1767 = vmatprep.subr.bf16.mxu0 %v3239_v6  ;;  %v3321_v6 = vld [vmem:[#allocation3 + $0x5c0] ss:$16 sps:$4 sm:$0xff]  }
  0x67   :  { %1714 = vmatmul.mubr.bf16.vlgmr.msra.gmra.mrb[0].mxu1 %v3770_v8 }
  0x68   :  { %1757 = vmatmul.mubr.bf16.vlgmr.msra.gmra.mrb[0].mxu0 %v3772_v9  ;;  %1854 = vmatpush1.bf16.msra.mxu1 %v3240_v11  ;;  %v3332_v11 = vld [vmem:[#allocation3 + $0x1ec] ss:$16 sps:$4 sm:$0xff]  }
  0x69   :  { %1768 = vmatpush1.bf16.msra.mxu0 %v3237_v10  ;;  %1855 = vmatprep.subr.bf16.mxu1 %v3248_v13  ;;  %v3329_v10 = vld [vmem:[#allocation3 + $0x5e4] ss:$16 sps:$4 sm:$0xff]   ;;  %v3330_v13 = vld [vmem:[#allocation3 + $0x1e8] ss:$16 sps:$4 sm:$0xff]  }
  0x6a   :  { %1769 = vmatprep.subr.bf16.mxu0 %v3245_v12  ;;  %1885 = vmatprep.mubr.bf16.mxu1 %v2737_v53  ;;  %v3297_v53 = vld [vmem:[#allocation3 + $0x540] ss:$16 sps:$4 sm:$0xff]  }
  0x6b   :  { %1799 = vmatprep.mubr.bf16.mxu0 %v3788_v38  ;;  %v3327_v12 = vld [vmem:[#allocation3 + $0x5e0] ss:$16 sps:$4 sm:$0xff]  }
  0x6c   :  { %1856 = vmatpush1.bf16.msra.mxu1 %v3246_v15  ;;  %v3338_v15 = vld [vmem:[#allocation3 + $0x20c] ss:$16 sps:$4 sm:$0xff]  }
  0x6d   :  { %1770 = vmatpush1.bf16.msra.mxu0 %v3243_v14  ;;  %1857 = vmatprep.subr.bf16.mxu1 %v3254_v17  ;;  %v3335_v14 = vld [vmem:[#allocation3 + $0x604] ss:$16 sps:$4 sm:$0xff]   ;;  %v3333_v17 = vld [vmem:[#allocation3 + $0x600] ss:$16 sps:$4 sm:$0xff]  }
  0x6e   :  { %1771 = vmatprep.subr.bf16.mxu0 %v3251_v16  ;;  %v3793_v16 = vcombine.low %v3779_v34, %v3784_v35  ;;  %v3362_v34 = vld [vmem:[#allocation3 + $0x28c] ss:$16 sps:$4 sm:$0xff]   ;;  %v3357_v35 = vld [vmem:[#allocation3 + $0x680] ss:$16 sps:$4 sm:$0xff]  }
  0x70   :  { %1858 = vmatpush1.bf16.msra.mxu1 %v3252_v19  ;;  %v3341_v19 = vld [vmem:[#allocation3 + $0x624] ss:$16 sps:$4 sm:$0xff]  }
  0x71   :  { %1772 = vmatpush1.bf16.msra.mxu0 %v3249_v18  ;;  %1859 = vmatprep.subr.bf16.mxu1 %v3260_v21  ;;  %v3336_v18 = vld [vmem:[#allocation3 + $0x208] ss:$16 sps:$4 sm:$0xff]  }
  0x72   :  { %1773 = vmatprep.subr.bf16.mxu0 %v3257_v20  ;;  %v3344_v20 = vld [vmem:[#allocation3 + $0x22c] ss:$16 sps:$4 sm:$0xff]  }
  0x73   :  { %v3798_v21 = vld [vmem:[%s3918_s0 + $0x18] sm:$0xff] }
  0x74   :  { %1860 = vmatpush1.bf16.msra.mxu1 %v3258_v23  ;;  %v3339_v23 = vld [vmem:[#allocation3 + $0x620] ss:$16 sps:$4 sm:$0xff]  }
  0x75   :  { %1774 = vmatpush1.bf16.msra.mxu0 %v3255_v22  ;;  %1861 = vmatprep.subr.bf16.mxu1 %v3266_v25  ;;  %v3803_v22 = vld [vmem:[%s3918_s0 + $0x38] sm:$0xff] }
  0x76   :  { %1775 = vmatprep.subr.bf16.mxu0 %v3263_v24  ;;  %v3342_v24 = vld [vmem:[#allocation3 + $0x228] ss:$16 sps:$4 sm:$0xff]   ;;  %v3809_v25 = vcombine.high %v3798_v21, %v3803_v22 }
  0x78   :  { %1862 = vmatpush1.bf16.msra.mxu1 %v3264_v27  ;;  %v3350_v27 = vld [vmem:[#allocation3 + $0x24c] ss:$16 sps:$4 sm:$0xff]  }
  0x79   :  { %1776 = vmatpush1.bf16.msra.mxu0 %v3261_v26  ;;  %1863 = vmatprep.subr.bf16.mxu1 %v3272_v29  ;;  %v3347_v26 = vld [vmem:[#allocation3 + $0x644] ss:$16 sps:$4 sm:$0xff]   ;;  %v3348_v29 = vld [vmem:[#allocation3 + $0x248] ss:$16 sps:$4 sm:$0xff]  }
  0x7a   :  { %1777 = vmatprep.subr.bf16.mxu0 %v3269_v28  ;;  %v3345_v28 = vld [vmem:[#allocation3 + $0x640] ss:$16 sps:$4 sm:$0xff]  }
  0x7c   :  { %1864 = vmatpush1.bf16.msra.mxu1 %v3270_v31  ;;  %v3351_v31 = vld [vmem:[#allocation3 + $0x660] ss:$16 sps:$4 sm:$0xff]  }
  0x7d   :  { %1778 = vmatpush1.bf16.msra.mxu0 %v3267_v30  ;;  %1865 = vmatprep.subr.bf16.mxu1 %v3278_v33  ;;  %v3356_v30 = vld [vmem:[#allocation3 + $0x26c] ss:$16 sps:$4 sm:$0xff]   ;;  %v3359_v33 = vld [vmem:[#allocation3 + $0x684] ss:$16 sps:$4 sm:$0xff]  }
  0x7e   :  { %1779 = vmatprep.subr.bf16.mxu0 %v3275_v32  ;;  %v3354_v32 = vld [vmem:[#allocation3 + $0x268] ss:$16 sps:$4 sm:$0xff]  }
  0x80   :  { %1866 = vmatpush1.bf16.msra.mxu1 %v3276_v37  ;;  %v3368_v37 = vld [vmem:[#allocation3 + $0x2ac] ss:$16 sps:$4 sm:$0xff]  }
  0x81   :  { %1780 = vmatpush1.bf16.msra.mxu0 %v3273_v36  ;;  %1867 = vmatprep.subr.bf16.mxu1 %v3284_v40  ;;  %v3360_v36 = vld [vmem:[#allocation3 + $0x288] ss:$16 sps:$4 sm:$0xff]  }
  0x82   :  { %1781 = vmatprep.subr.bf16.mxu0 %v3281_v39  ;;  %v3363_v39 = vld [vmem:[#allocation3 + $0x6a0] ss:$16 sps:$4 sm:$0xff]   ;;  %v3366_v40 = vld [vmem:[#allocation3 + $0x2a8] ss:$16 sps:$4 sm:$0xff]  }
  0x84   :  { %1868 = vmatpush1.bf16.msra.mxu1 %v3282_v42  ;;  %v3374_v42 = vld [vmem:[#allocation3 + $0x2cc] ss:$16 sps:$4 sm:$0xff]  }
  0x85   :  { %1782 = vmatpush1.bf16.msra.mxu0 %v3279_v41  ;;  %1869 = vmatprep.subr.bf16.mxu1 %v3290_v44  ;;  %v3371_v41 = vld [vmem:[#allocation3 + $0x6c4] ss:$16 sps:$4 sm:$0xff]   ;;  %v3372_v44 = vld [vmem:[#allocation3 + $0x2c8] ss:$16 sps:$4 sm:$0xff]  }
  0x86   :  { %1783 = vmatprep.subr.bf16.mxu0 %v3287_v43  ;;  %v3369_v43 = vld [vmem:[#allocation3 + $0x6c0] ss:$16 sps:$4 sm:$0xff]  }
  0x88   :  { %1870 = vmatpush1.bf16.msra.mxu1 %v3288_v46  ;;  %v3380_v46 = vld [vmem:[#allocation3 + $0x2ec] ss:$16 sps:$4 sm:$0xff]  }
  0x89   :  { %1784 = vmatpush1.bf16.msra.mxu0 %v3285_v45  ;;  %1871 = vmatprep.subr.bf16.mxu1 %v3296_v48  ;;  %v3377_v45 = vld [vmem:[#allocation3 + $0x6e4] ss:$16 sps:$4 sm:$0xff]   ;;  %v3378_v48 = vld [vmem:[#allocation3 + $0x2e8] ss:$16 sps:$4 sm:$0xff]  }
  0x8a   :  { %1785 = vmatprep.subr.bf16.mxu0 %v3293_v47  ;;  %v3375_v47 = vld [vmem:[#allocation3 + $0x6e0] ss:$16 sps:$4 sm:$0xff]  }
  0x8c   :  { %1872 = vmatpush1.bf16.msra.mxu1 %v3294_v50  ;;  %v3386_v50 = vld [vmem:[#allocation3 + $0x30c] ss:$16 sps:$4 sm:$0xff]  }
  0x8d   :  { %1786 = vmatpush1.bf16.msra.mxu0 %v3291_v49  ;;  %1873 = vmatprep.subr.bf16.mxu1 %v3302_v52  ;;  %v3383_v49 = vld [vmem:[#allocation3 + $0x704] ss:$16 sps:$4 sm:$0xff]   ;;  %v3384_v52 = vld [vmem:[#allocation3 + $0x308] ss:$16 sps:$4 sm:$0xff]  }
  0x8e   :  { %1787 = vmatprep.subr.bf16.mxu0 %v3299_v51  ;;  %v3381_v51 = vld [vmem:[#allocation3 + $0x700] ss:$16 sps:$4 sm:$0xff]  }
  0x90   :  { %1874 = vmatpush1.bf16.msra.mxu1 %v3300_v54  ;;  %v3392_v54 = vld [vmem:[#allocation3 + $0x32c] ss:$16 sps:$4 sm:$0xff]  }
  0x91   :  { %1788 = vmatpush1.bf16.msra.mxu0 %v3297_v53  ;;  %1875 = vmatprep.subr.bf16.mxu1 %v3308_v57  ;;  %v3389_v53 = vld [vmem:[#allocation3 + $0x724] ss:$16 sps:$4 sm:$0xff]   ;;  %v3390_v57 = vld [vmem:[#allocation3 + $0x328] ss:$16 sps:$4 sm:$0xff]  }
  0x92   :  { %1789 = vmatprep.subr.bf16.mxu0 %v3305_v56  ;;  %v3387_v56 = vld [vmem:[#allocation3 + $0x720] ss:$16 sps:$4 sm:$0xff]  }
  0x94   :  { %1876 = vmatpush1.bf16.msra.mxu1 %v3306_v59  ;;  %v3398_v59 = vld [vmem:[#allocation3 + $0x34c] ss:$16 sps:$4 sm:$0xff]  }
  0x95   :  { %1790 = vmatpush1.bf16.msra.mxu0 %v3303_v58  ;;  %1877 = vmatprep.subr.bf16.mxu1 %v3314_v61  ;;  %v3395_v58 = vld [vmem:[#allocation3 + $0x744] ss:$16 sps:$4 sm:$0xff]   ;;  %v3396_v61 = vld [vmem:[#allocation3 + $0x348] ss:$16 sps:$4 sm:$0xff]  }
  0x96   :  { %1791 = vmatprep.subr.bf16.mxu0 %v3311_v60  ;;  %v3393_v60 = vld [vmem:[#allocation3 + $0x740] ss:$16 sps:$4 sm:$0xff]  }
  0x98   :  { %1878 = vmatpush1.bf16.msra.mxu1 %v3312_v63  ;;  %v3404_v63 = vld [vmem:[#allocation3 + $0x36c] ss:$16 sps:$4 sm:$0xff]  }
  0x99   :  { %1792 = vmatpush1.bf16.msra.mxu0 %v3309_v62  ;;  %1879 = vmatprep.subr.bf16.mxu1 %v3320_v1  ;;  %v3401_v62 = vld [vmem:[#allocation3 + $0x764] ss:$16 sps:$4 sm:$0xff]   ;;  %v3402_v1 = vld [vmem:[#allocation3 + $0x368] ss:$16 sps:$4 sm:$0xff]  }
  0x9a   :  { %1793 = vmatprep.subr.bf16.mxu0 %v3317_v0  ;;  %v3399_v0 = vld [vmem:[#allocation3 + $0x760] ss:$16 sps:$4 sm:$0xff]  }
  0x9c   :  { %1880 = vmatpush1.bf16.msra.mxu1 %v3318_v3  ;;  %v3410_v3 = vld [vmem:[#allocation3 + $0x38c] ss:$16 sps:$4 sm:$0xff]  }
  0x9d   :  { %1794 = vmatpush1.bf16.msra.mxu0 %v3315_v2  ;;  %1881 = vmatprep.subr.bf16.mxu1 %v3326_v5  ;;  %v3407_v2 = vld [vmem:[#allocation3 + $0x784] ss:$16 sps:$4 sm:$0xff]   ;;  %v3408_v5 = vld [vmem:[#allocation3 + $0x388] ss:$16 sps:$4 sm:$0xff]  }
  0x9e   :  { %1795 = vmatprep.subr.bf16.mxu0 %v3323_v4  ;;  %v3405_v4 = vld [vmem:[#allocation3 + $0x780] ss:$16 sps:$4 sm:$0xff]  }
  0xa0   :  { %1882 = vmatpush1.bf16.msra.mxu1 %v3324_v7  ;;  %v3416_v7 = vld [vmem:[#allocation3 + $0x3ac] ss:$16 sps:$4 sm:$0xff]  }
  0xa1   :  { %1796 = vmatpush1.bf16.msra.mxu0 %v3321_v6  ;;  %1883 = vmatprep.subr.bf16.mxu1 %v3332_v11  ;;  %v3413_v6 = vld [vmem:[#allocation3 + $0x7a4] ss:$16 sps:$4 sm:$0xff]   ;;  %v3414_v11 = vld [vmem:[#allocation3 + $0x3a8] ss:$16 sps:$4 sm:$0xff]  }
  0xa2   :  { %1797 = vmatprep.subr.bf16.mxu0 %v3329_v10  ;;  %v3411_v10 = vld [vmem:[#allocation3 + $0x7a0] ss:$16 sps:$4 sm:$0xff]  }
  0xa4   :  { %1884 = vmatpush1.bf16.msra.mxu1 %v3330_v13  ;;  %v3422_v13 = vld [vmem:[#allocation3 + $0x3cc] ss:$16 sps:$4 sm:$0xff]  }
  0xa5   :  { %1798 = vmatpush1.bf16.msra.mxu0 %v3327_v12  ;;  %1896 = vmatprep.subr.bf16.mxu1 %v3338_v15  ;;  %v3419_v12 = vld [vmem:[#allocation3 + $0x7c4] ss:$16 sps:$4 sm:$0xff]   ;;  %v3420_v15 = vld [vmem:[#allocation3 + $0x3c8] ss:$16 sps:$4 sm:$0xff]  }
  0xa6   :  { %1810 = vmatprep.subr.bf16.mxu0 %v3335_v14  ;;  %v3417_v14 = vld [vmem:[#allocation3 + $0x7c0] ss:$16 sps:$4 sm:$0xff]  }
  0xa7   :  { %1886 = vmatmul.mubr.bf16.vlgmr.msra.gmra.mrb[4].mxu1 %v3770_v8  ;;  %v3353_v8 = vld [vmem:[#allocation3 + $0x664] ss:$16 sps:$4 sm:$0xff]  }
  0xa8   :  { %1800 = vmatmul.mubr.bf16.vlgmr.msra.gmra.mrb[0].mxu0 %v3793_v16  ;;  %1897 = vmatpush1.bf16.msra.mxu1 %v3336_v18  ;;  %v3428_v18 = vld [vmem:[#allocation3 + $0x3ec] ss:$16 sps:$4 sm:$0xff]  }
  0xa9   :  { %1811 = vmatpush1.bf16.msra.mxu0 %v3333_v17  ;;  %1898 = vmatprep.subr.bf16.mxu1 %v3344_v20  ;;  %v3425_v17 = vld [vmem:[#allocation3 + $0x7e4] ss:$16 sps:$4 sm:$0xff]   ;;  %v3426_v20 = vld [vmem:[#allocation3 + $0x3e8] ss:$16 sps:$4 sm:$0xff]  }
  0xaa   :  { %1812 = vmatprep.subr.bf16.mxu0 %v3341_v19  ;;  %1842 = vmatprep.mubr.bf16.mxu0 %v3809_v25  ;;  %v3423_v19 = vld [vmem:[#allocation3 + $0x7e0] ss:$16 sps:$4 sm:$0xff]  }
  0xab   :  { %1928 = vmatprep.mubr.bf16.mxu1 %v3767_v55  ;;  %v3365_v55 = vld [vmem:[#allocation3 + $0x6a4] ss:$16 sps:$4 sm:$0xff]  }
  0xac   :  { %1899 = vmatpush1.bf16.msra.mxu1 %v3342_v24  ;;  %v3429_v24 = vld [vmem:[#allocation3 + $0x408] ss:$16 sps:$4 sm:$0xff]  }
  0xad   :  { %1813 = vmatpush1.bf16.msra.mxu0 %v3339_v23  ;;  %1900 = vmatprep.subr.bf16.mxu1 %v3350_v27  ;;  %v3431_v23 = vld [vmem:[#allocation3 + $0x40c] ss:$16 sps:$4 sm:$0xff]  }
  0xae   :  { %1814 = vmatprep.subr.bf16.mxu0 %v3347_v26  ;;  %v3815_v26 = vcombine.low %v3798_v21, %v3803_v22  ;;  %v3434_v27 = vld [vmem:[#allocation3 + $0x42c] ss:$16 sps:$4 sm:$0xff]   ;;  %v3528_v21 = vld [vmem:[#allocation5 + $0x10] ss:$8 sps:$4 sm:$0xff]  }
  0xaf   :  { %v3533_v22 = vld [vmem:[#allocation5 + $0x24] ss:$8 sps:$4 sm:$0xff]  }
  0xb0   :  { %1901 = vmatpush1.bf16.msra.mxu1 %v3348_v29  ;;  %v3527_v29 = vld [vmem:[#allocation5 + $0x4] ss:$8 sps:$4 sm:$0xff]  }
  0xb1   :  { %1815 = vmatpush1.bf16.msra.mxu0 %v3345_v28  ;;  %1902 = vmatprep.subr.bf16.mxu1 %v3356_v30  ;;  %v3525_v28 = vld [vmem:[#allocation5] ss:$8 sps:$4 sm:$0xff]   ;;  %v3530_v30 = vld [vmem:[#allocation5 + $0x14] ss:$8 sps:$4 sm:$0xff]  }
  0xb2   :  { %1816 = vmatprep.subr.bf16.mxu0 %v3353_v8  ;;  %v3432_v8 = vld [vmem:[#allocation3 + $0x428] ss:$16 sps:$4 sm:$0xff]  }
  0xb4   :  { %1903 = vmatpush1.bf16.msra.mxu1 %v3354_v32  ;;  %v3435_v32 = vld [vmem:[#allocation3 + $0x448] ss:$16 sps:$4 sm:$0xff]  }
  0xb5   :  { %1817 = vmatpush1.bf16.msra.mxu0 %v3351_v31  ;;  %1904 = vmatprep.subr.bf16.mxu1 %v3362_v34  ;;  %v3437_v31 = vld [vmem:[#allocation3 + $0x44c] ss:$16 sps:$4 sm:$0xff]   ;;  %v3438_v34 = vld [vmem:[#allocation3 + $0x468] ss:$16 sps:$4 sm:$0xff]  }
  0xb6   :  { %1818 = vmatprep.subr.bf16.mxu0 %v3359_v33  ;;  %v3440_v33 = vld [vmem:[#allocation3 + $0x46c] ss:$16 sps:$4 sm:$0xff]  }
  0xb8   :  { %1905 = vmatpush1.bf16.msra.mxu1 %v3360_v36  ;;  %v3536_v36 = vld [vmem:[#allocation5 + $0x34] ss:$8 sps:$4 sm:$0xff]  }
  0xb9   :  { %1819 = vmatpush1.bf16.msra.mxu0 %v3357_v35  ;;  %1906 = vmatprep.subr.bf16.mxu1 %v3368_v37  ;;  %v3443_v35 = vld [vmem:[#allocation3 + $0x48c] ss:$16 sps:$4 sm:$0xff]  }
  0xba   :  { %1820 = vmatprep.subr.bf16.mxu0 %v3365_v55  ;;  %v3441_v55 = vld [vmem:[#allocation3 + $0x488] ss:$16 sps:$4 sm:$0xff]   ;;  %v3539_v37 = vld [vmem:[#allocation5 + $0x44] ss:$8 sps:$4 sm:$0xff]  }
  0xbc   :  { %1907 = vmatpush1.bf16.msra.mxu1 %v3366_v40  ;;  %v3537_v40 = vld [vmem:[#allocation5 + $0x40] ss:$8 sps:$4 sm:$0xff]  }
  0xbd   :  { %1821 = vmatpush1.bf16.msra.mxu0 %v3363_v39  ;;  %1908 = vmatprep.subr.bf16.mxu1 %v3374_v42  ;;  %v3446_v39 = vld [vmem:[#allocation3 + $0x4ac] ss:$16 sps:$4 sm:$0xff]   ;;  %v3444_v42 = vld [vmem:[#allocation3 + $0x4a8] ss:$16 sps:$4 sm:$0xff]  }
  0xbe   :  { %1822 = vmatprep.subr.bf16.mxu0 %v3371_v41  ;;  %v3542_v41 = vld [vmem:[#allocation5 + $0x54] ss:$8 sps:$4 sm:$0xff]  }
  0xc0   :  { %1909 = vmatpush1.bf16.msra.mxu1 %v3372_v44  ;;  %v3540_v44 = vld [vmem:[#allocation5 + $0x50] ss:$8 sps:$4 sm:$0xff]  }
  0xc1   :  { %1823 = vmatpush1.bf16.msra.mxu0 %v3369_v43  ;;  %1910 = vmatprep.subr.bf16.mxu1 %v3380_v46  ;;  %v3449_v43 = vld [vmem:[#allocation3 + $0x4cc] ss:$16 sps:$4 sm:$0xff]   ;;  %v3447_v46 = vld [vmem:[#allocation3 + $0x4c8] ss:$16 sps:$4 sm:$0xff]  }
  0xc2   :  { %1824 = vmatprep.subr.bf16.mxu0 %v3377_v45  ;;  %v3545_v45 = vld [vmem:[#allocation5 + $0x64] ss:$8 sps:$4 sm:$0xff]  }
  0xc4   :  { %1911 = vmatpush1.bf16.msra.mxu1 %v3378_v48  ;;  %v3543_v48 = vld [vmem:[#allocation5 + $0x60] ss:$8 sps:$4 sm:$0xff]  }
  0xc5   :  { %1825 = vmatpush1.bf16.msra.mxu0 %v3375_v47  ;;  %1912 = vmatprep.subr.bf16.mxu1 %v3386_v50  ;;  %v3452_v47 = vld [vmem:[#allocation3 + $0x4ec] ss:$16 sps:$4 sm:$0xff]   ;;  %v3450_v50 = vld [vmem:[#allocation3 + $0x4e8] ss:$16 sps:$4 sm:$0xff]  }
  0xc6   :  { %1826 = vmatprep.subr.bf16.mxu0 %v3383_v49  ;;  %v3548_v49 = vld [vmem:[#allocation5 + $0x74] ss:$8 sps:$4 sm:$0xff]  }
  0xc8   :  { %1913 = vmatpush1.bf16.msra.mxu1 %v3384_v52  ;;  %v3546_v52 = vld [vmem:[#allocation5 + $0x70] ss:$8 sps:$4 sm:$0xff]  }
  0xc9   :  { %1827 = vmatpush1.bf16.msra.mxu0 %v3381_v51  ;;  %1914 = vmatprep.subr.bf16.mxu1 %v3392_v54  ;;  %v3455_v51 = vld [vmem:[#allocation3 + $0x50c] ss:$16 sps:$4 sm:$0xff]   ;;  %v3453_v54 = vld [vmem:[#allocation3 + $0x508] ss:$16 sps:$4 sm:$0xff]  }
  0xca   :  { %1828 = vmatprep.subr.bf16.mxu0 %v3389_v53  ;;  %v3551_v53 = vld [vmem:[#allocation5 + $0x84] ss:$8 sps:$4 sm:$0xff]  }
  0xcc   :  { %1915 = vmatpush1.bf16.msra.mxu1 %v3390_v57  ;;  %v3549_v57 = vld [vmem:[#allocation5 + $0x80] ss:$8 sps:$4 sm:$0xff]  }
  0xcd   :  { %1829 = vmatpush1.bf16.msra.mxu0 %v3387_v56  ;;  %1916 = vmatprep.subr.bf16.mxu1 %v3398_v59  ;;  %v3458_v56 = vld [vmem:[#allocation3 + $0x52c] ss:$16 sps:$4 sm:$0xff]   ;;  %v3456_v59 = vld [vmem:[#allocation3 + $0x528] ss:$16 sps:$4 sm:$0xff]  }
  0xce   :  { %1830 = vmatprep.subr.bf16.mxu0 %v3395_v58  ;;  %v3554_v58 = vld [vmem:[#allocation5 + $0x94] ss:$8 sps:$4 sm:$0xff]  }
  0xd0   :  { %1917 = vmatpush1.bf16.msra.mxu1 %v3396_v61  ;;  %v3552_v61 = vld [vmem:[#allocation5 + $0x90] ss:$8 sps:$4 sm:$0xff]  }
  0xd1   :  { %1831 = vmatpush1.bf16.msra.mxu0 %v3393_v60  ;;  %1918 = vmatprep.subr.bf16.mxu1 %v3404_v63  ;;  %v3461_v60 = vld [vmem:[#allocation3 + $0x54c] ss:$16 sps:$4 sm:$0xff]   ;;  %v3459_v63 = vld [vmem:[#allocation3 + $0x548] ss:$16 sps:$4 sm:$0xff]  }
  0xd2   :  { %1832 = vmatprep.subr.bf16.mxu0 %v3401_v62  ;;  %v3557_v62 = vld [vmem:[#allocation5 + $0xa4] ss:$8 sps:$4 sm:$0xff]  }
  0xd4   :  { %1919 = vmatpush1.bf16.msra.mxu1 %v3402_v1  ;;  %v3555_v1 = vld [vmem:[#allocation5 + $0xa0] ss:$8 sps:$4 sm:$0xff]  }
  0xd5   :  { %1833 = vmatpush1.bf16.msra.mxu0 %v3399_v0  ;;  %1920 = vmatprep.subr.bf16.mxu1 %v3410_v3  ;;  %v3464_v0 = vld [vmem:[#allocation3 + $0x56c] ss:$16 sps:$4 sm:$0xff]   ;;  %v3462_v3 = vld [vmem:[#allocation3 + $0x568] ss:$16 sps:$4 sm:$0xff]  }
  0xd6   :  { %1834 = vmatprep.subr.bf16.mxu0 %v3407_v2  ;;  %v3560_v2 = vld [vmem:[#allocation5 + $0xb4] ss:$8 sps:$4 sm:$0xff]  }
  0xd8   :  { %1921 = vmatpush1.bf16.msra.mxu1 %v3408_v5  ;;  %v3558_v5 = vld [vmem:[#allocation5 + $0xb0] ss:$8 sps:$4 sm:$0xff]  }
  0xd9   :  { %1835 = vmatpush1.bf16.msra.mxu0 %v3405_v4  ;;  %1922 = vmatprep.subr.bf16.mxu1 %v3416_v7  ;;  %v3467_v4 = vld [vmem:[#allocation3 + $0x58c] ss:$16 sps:$4 sm:$0xff]   ;;  %v3465_v7 = vld [vmem:[#allocation3 + $0x588] ss:$16 sps:$4 sm:$0xff]  }
  0xda   :  { %1836 = vmatprep.subr.bf16.mxu0 %v3413_v6  ;;  %v3563_v6 = vld [vmem:[#allocation5 + $0xc4] ss:$8 sps:$4 sm:$0xff]  }
  0xdc   :  { %1923 = vmatpush1.bf16.msra.mxu1 %v3414_v11  ;;  %v3561_v11 = vld [vmem:[#allocation5 + $0xc0] ss:$8 sps:$4 sm:$0xff]  }
  0xdd   :  { %1837 = vmatpush1.bf16.msra.mxu0 %v3411_v10  ;;  %1924 = vmatprep.subr.bf16.mxu1 %v3422_v13  ;;  %v3470_v10 = vld [vmem:[#allocation3 + $0x5ac] ss:$16 sps:$4 sm:$0xff]  }
  0xde   :  { %1838 = vmatprep.subr.bf16.mxu0 %v3419_v12  ;;  %v3468_v12 = vld [vmem:[#allocation3 + $0x5a8] ss:$16 sps:$4 sm:$0xff]   ;;  %v3473_v13 = vld [vmem:[#allocation3 + $0x5cc] ss:$16 sps:$4 sm:$0xff]  }
  0xe0   :  { %1925 = vmatpush1.bf16.msra.mxu1 %v3420_v15  ;;  %v3476_v15 = vld [vmem:[#allocation3 + $0x5ec] ss:$16 sps:$4 sm:$0xff]  }
  0xe1   :  { %1839 = vmatpush1.bf16.msra.mxu0 %v3417_v14  ;;  %1926 = vmatprep.subr.bf16.mxu1 %v3428_v18  ;;  %v3471_v14 = vld [vmem:[#allocation3 + $0x5c8] ss:$16 sps:$4 sm:$0xff]   ;;  %v3479_v18 = vld [vmem:[#allocation3 + $0x60c] ss:$16 sps:$4 sm:$0xff]  }
  0xe2   :  { %1840 = vmatprep.subr.bf16.mxu0 %v3425_v17  ;;  %v3474_v17 = vld [vmem:[#allocation3 + $0x5e8] ss:$16 sps:$4 sm:$0xff]  }
  0xe4   :  { %1927 = vmatpush1.bf16.msra.mxu1 %v3426_v20  ;;  %v3482_v20 = vld [vmem:[#allocation3 + $0x62c] ss:$16 sps:$4 sm:$0xff]  }
  0xe5   :  { %1841 = vmatpush1.bf16.msra.mxu0 %v3423_v19  ;;  %1939 = vmatprep.subr.bf16.mxu1 %v3431_v23  ;;  %v3477_v19 = vld [vmem:[#allocation3 + $0x608] ss:$16 sps:$4 sm:$0xff]  }
  0xe6   :  { %2460 = vmatprep.subr.bf16.mxu0 %v3527_v29  ;;  %v3480_v23 = vld [vmem:[#allocation3 + $0x628] ss:$16 sps:$4 sm:$0xff]  }
  0xe7   :  { %1929 = vmatmul.mubr.bf16.vlgmr.msra.gmra.mrb[4].mxu1 %v3772_v9  ;;  %v3531_v9 = vld [vmem:[#allocation5 + $0x20] ss:$8 sps:$4 sm:$0xff]  }
  0xe8   :  { %1843 = vmatmul.mubr.bf16.vlgmr.msra.gmra.mrb[0].mxu0 %v3815_v26  ;;  %1940 = vmatpush1.bf16.msra.mxu1 %v3429_v24  ;;  %v3485_v24 = vld [vmem:[#allocation3 + $0x64c] ss:$16 sps:$4 sm:$0xff]   ;;  %v3486_v29 = vld [vmem:[#allocation3 + $0x668] ss:$16 sps:$4 sm:$0xff]  }
  0xe9   :  { %1971 = vmatprep.mubr.bf16.mxu1 %v3788_v38  ;;  %1941 = vmatprep.subr.bf16.mxu1 %v3434_v27  ;;  %v3534_v38 = vld [vmem:[#allocation5 + $0x30] ss:$8 sps:$4 sm:$0xff]  }
  0xea   :  { %2461 = vmatpush1.bf16.msra.mxu0 %v3525_v28  ;;  %v3483_v27 = vld [vmem:[#allocation3 + $0x648] ss:$16 sps:$4 sm:$0xff]   ;;  %v3488_v28 = vld [vmem:[#allocation3 + $0x66c] ss:$16 sps:$4 sm:$0xff]  }
  0xeb   :  { %2462 = vmatprep.subr.bf16.mxu0 %v3530_v30  ;;  %v3489_v30 = vld [vmem:[#allocation3 + $0x688] ss:$16 sps:$4 sm:$0xff]  }
  0xec   :  { %1942 = vmatpush1.bf16.msra.mxu1 %v3432_v8  ;;  %v3491_v8 = vld [vmem:[#allocation3 + $0x68c] ss:$16 sps:$4 sm:$0xff]  }
  0xed   :  { %1943 = vmatprep.subr.bf16.mxu1 %v3437_v31  ;;  %v3494_v31 = vld [vmem:[#allocation3 + $0x6ac] ss:$16 sps:$4 sm:$0xff]  }
  0xee   :  { %2463 = vmatpush1.bf16.msra.mxu0 %v3528_v21  ;;  %v3497_v21 = vld [vmem:[#allocation3 + $0x6cc] ss:$16 sps:$4 sm:$0xff]  }
  0xef   :  { %2464 = vmatprep.subr.bf16.mxu0 %v3533_v22  ;;  %v3566_v22 = vld [vmem:[#allocation5 + $0xd4] ss:$8 sps:$4 sm:$0xff]  }
  0xf0   :  { %1944 = vmatpush1.bf16.msra.mxu1 %v3435_v32  ;;  %v3564_v32 = vld [vmem:[#allocation5 + $0xd0] ss:$8 sps:$4 sm:$0xff]  }
  0xf1   :  { %1945 = vmatprep.subr.bf16.mxu1 %v3440_v33 }
  0xf2   :  { %2465 = vmatpush1.bf16.msra.mxu0 %v3531_v9 }
  0xf3   :  { %2466 = vmatprep.subr.bf16.mxu0 %v3536_v36  ;;  %v3500_v36 = vld [vmem:[#allocation3 + $0x6ec] ss:$16 sps:$4 sm:$0xff]  }
  0xf4   :  { %1946 = vmatpush1.bf16.msra.mxu1 %v3438_v34  ;;  %v3495_v34 = vld [vmem:[#allocation3 + $0x6c8] ss:$16 sps:$4 sm:$0xff]  }
  0xf5   :  { %1947 = vmatprep.subr.bf16.mxu1 %v3443_v35 }
  0xf6   :  { %2467 = vmatpush1.bf16.msra.mxu0 %v3534_v38  ;;  %v3569_v38 = vld [vmem:[#allocation5 + $0xe4] ss:$8 sps:$4 sm:$0xff]  }
  0xf7   :  { %2468 = vmatprep.subr.bf16.mxu0 %v3539_v37  ;;  %v3498_v37 = vld [vmem:[#allocation3 + $0x6e8] ss:$16 sps:$4 sm:$0xff]  }
  0xf8   :  { %1948 = vmatpush1.bf16.msra.mxu1 %v3441_v55  ;;  %v3567_v55 = vld [vmem:[#allocation5 + $0xe0] ss:$8 sps:$4 sm:$0xff]  }
  0xf9   :  { %1949 = vmatprep.subr.bf16.mxu1 %v3446_v39  ;;  %v3503_v39 = vld [vmem:[#allocation3 + $0x70c] ss:$16 sps:$4 sm:$0xff]  }
  0xfa   :  { %2469 = vmatpush1.bf16.msra.mxu0 %v3537_v40  ;;  %v3572_v40 = vld [vmem:[#allocation5 + $0xf4] ss:$8 sps:$4 sm:$0xff]  }
  0xfb   :  { %2470 = vmatprep.subr.bf16.mxu0 %v3542_v41  ;;  %v3570_v41 = vld [vmem:[#allocation5 + $0xf0] ss:$8 sps:$4 sm:$0xff]  }
  0xfc   :  { %1950 = vmatpush1.bf16.msra.mxu1 %v3444_v42  ;;  %v3501_v42 = vld [vmem:[#allocation3 + $0x708] ss:$16 sps:$4 sm:$0xff]  }
  0xfd   :  { %1951 = vmatprep.subr.bf16.mxu1 %v3449_v43  ;;  %v3506_v43 = vld [vmem:[#allocation3 + $0x72c] ss:$16 sps:$4 sm:$0xff]  }
  0xfe   :  { %2471 = vmatpush1.bf16.msra.mxu0 %v3540_v44  ;;  %v3575_v44 = vld [vmem:[#allocation5 + $0x104] ss:$8 sps:$4 sm:$0xff]  }
  0xff   :  { %2472 = vmatprep.subr.bf16.mxu0 %v3545_v45  ;;  %v3504_v45 = vld [vmem:[#allocation3 + $0x728] ss:$16 sps:$4 sm:$0xff]  }
 0x100   :  { %1952 = vmatpush1.bf16.msra.mxu1 %v3447_v46  ;;  %v3509_v46 = vld [vmem:[#allocation3 + $0x74c] ss:$16 sps:$4 sm:$0xff]  }
 0x101   :  { %1953 = vmatprep.subr.bf16.mxu1 %v3452_v47  ;;  %v3507_v47 = vld [vmem:[#allocation3 + $0x748] ss:$16 sps:$4 sm:$0xff]  }
 0x102   :  { %2473 = vmatpush1.bf16.msra.mxu0 %v3543_v48  ;;  %v3512_v48 = vld [vmem:[#allocation3 + $0x76c] ss:$16 sps:$4 sm:$0xff]  }
 0x103   :  { %2474 = vmatprep.subr.bf16.mxu0 %v3548_v49  ;;  %v3510_v49 = vld [vmem:[#allocation3 + $0x768] ss:$16 sps:$4 sm:$0xff]  }
 0x104   :  { %1954 = vmatpush1.bf16.msra.mxu1 %v3450_v50  ;;  %v3515_v50 = vld [vmem:[#allocation3 + $0x78c] ss:$16 sps:$4 sm:$0xff]  }
 0x105   :  { %1955 = vmatprep.subr.bf16.mxu1 %v3455_v51  ;;  %v3513_v51 = vld [vmem:[#allocation3 + $0x788] ss:$16 sps:$4 sm:$0xff]  }
 0x106   :  { %2475 = vmatpush1.bf16.msra.mxu0 %v3546_v52  ;;  %v3518_v52 = vld [vmem:[#allocation3 + $0x7ac] ss:$16 sps:$4 sm:$0xff]  }
 0x107   :  { %2476 = vmatprep.subr.bf16.mxu0 %v3551_v53  ;;  %v3516_v53 = vld [vmem:[#allocation3 + $0x7a8] ss:$16 sps:$4 sm:$0xff]  }
 0x108   :  { %1956 = vmatpush1.bf16.msra.mxu1 %v3453_v54  ;;  %v3521_v54 = vld [vmem:[#allocation3 + $0x7cc] ss:$16 sps:$4 sm:$0xff]  }
 0x109   :  { %1957 = vmatprep.subr.bf16.mxu1 %v3458_v56  ;;  %v3519_v56 = vld [vmem:[#allocation3 + $0x7c8] ss:$16 sps:$4 sm:$0xff]  }
 0x10a   :  { %2477 = vmatpush1.bf16.msra.mxu0 %v3549_v57  ;;  %v3524_v57 = vld [vmem:[#allocation3 + $0x7ec] ss:$16 sps:$4 sm:$0xff]  }
 0x10b   :  { %2478 = vmatprep.subr.bf16.mxu0 %v3554_v58  ;;  %v3522_v58 = vld [vmem:[#allocation3 + $0x7e8] ss:$16 sps:$4 sm:$0xff]  }
 0x10c   :  { %1958 = vmatpush1.bf16.msra.mxu1 %v3456_v59  ;;  %v61_v59 = vlaneseq }
 0x10d   :  { %1959 = vmatprep.subr.bf16.mxu1 %v3461_v60 }
 0x10e   :  { %2479 = vmatpush1.bf16.msra.mxu0 %v3552_v61  ;;  %v3831_v60 = vshrl.u32 %v61_v59, 7  ;;  %v3615_v59 = vld [vmem:[#allocation5 + $0x1e0] ss:$8 sps:$4 sm:$0xff]  }
 0x10f   :  { %2480 = vmatprep.subr.bf16.mxu0 %v3557_v62  ;;  %v3837_v62 = vld [vmem:[%s3920_s2] sm:$0xf] }
 0x110   :  { %1960 = vmatpush1.bf16.msra.mxu1 %v3459_v63  ;;  %v63_v61 = vsub.s32 0, %v3831_v60  ;;  %v67_v63 = vsub.s32 1, %v3831_v60 }
 0x111   :  { %1961 = vmatprep.subr.bf16.mxu1 %v3464_v0 }
 0x112   :  { %2481 = vmatpush1.bf16.msra.mxu0 %v3555_v1  ;;  %v64_v0 = vrot.slane %v3837_v62, %v63_v61 }
 0x113   :  { %2482 = vmatprep.subr.bf16.mxu0 %v3560_v2 }
 0x114   :  { %1962 = vmatpush1.bf16.msra.mxu1 %v3462_v3 }
 0x115   :  { %1963 = vmatprep.subr.bf16.mxu1 %v3467_v4 }
 0x116   :  { %2483 = vmatpush1.bf16.msra.mxu0 %v3558_v5 }
 0x117   :  { %2484 = vmatprep.subr.bf16.mxu0 %v3563_v6 }
 0x118   :  { %1964 = vmatpush1.bf16.msra.mxu1 %v3465_v7 }
 0x119   :  { %1965 = vmatprep.subr.bf16.mxu1 %v3470_v10 }
 0x11a   :  { %2485 = vmatpush1.bf16.msra.mxu0 %v3561_v11 }
 0x11b   :  { %2486 = vmatprep.subr.bf16.mxu0 %v3566_v22  ;;  %v3579_v22 = vld [vmem:[#allocation5 + $0x120] ss:$8 sps:$4 sm:$0xff]  }
 0x11c   :  { %1966 = vmatpush1.bf16.msra.mxu1 %v3468_v12 }
 0x11d   :  { %1967 = vmatprep.subr.bf16.mxu1 %v3473_v13 }
 0x11e   :  { %2487 = vmatpush1.bf16.msra.mxu0 %v3564_v32  ;;  %v3584_v32 = vld [vmem:[#allocation5 + $0x134] ss:$8 sps:$4 sm:$0xff]  }
 0x11f   :  { %2488 = vmatprep.subr.bf16.mxu0 %v3569_v38  ;;  %v3585_v38 = vld [vmem:[#allocation5 + $0x140] ss:$8 sps:$4 sm:$0xff]  }
 0x120   :  { %1968 = vmatpush1.bf16.msra.mxu1 %v3471_v14 }
 0x121   :  { %1969 = vmatprep.subr.bf16.mxu1 %v3476_v15 }
 0x122   :  { %2489 = vmatpush1.bf16.msra.mxu0 %v3567_v55  ;;  %v3630_v55 = vld [vmem:[%s3923_s5 + $0x20] sm:$0xff]  }
 0x123   :  { %2490 = vmatprep.subr.bf16.mxu0 %v3572_v40  ;;  %v3588_v40 = vld [vmem:[#allocation5 + $0x150] ss:$8 sps:$4 sm:$0xff]  }
 0x124   :  { %1970 = vmatpush1.bf16.msra.mxu1 %v3474_v17 }
 0x125   :  { %1982 = vmatprep.subr.bf16.mxu1 %v3479_v18 }
 0x126   :  { %2491 = vmatpush1.bf16.msra.mxu0 %v3570_v41  ;;  %v3593_v41 = vld [vmem:[#allocation5 + $0x164] ss:$8 sps:$4 sm:$0xff]  }
 0x127   :  { %1972 = vmatmul.mubr.bf16.vlgmr.msra.gmra.mrb[4].mxu1 %v3793_v16  ;;  %v3492_v16 = vld [vmem:[#allocation3 + $0x6a8] ss:$16 sps:$4 sm:$0xff]   ;;  %2503 = vmatprep.subr.bf16.mxu0 %v3575_v44 }
 0x128   :  { %1983 = vmatpush1.bf16.msra.mxu1 %v3477_v19  ;;  %2014 = vmatprep.mubr.bf16.mxu1 %v3809_v25  ;;  %v3594_v44 = vld [vmem:[#allocation5 + $0x170] ss:$8 sps:$4 sm:$0xff]  }
 0x129   :  { %1984 = vmatprep.subr.bf16.mxu1 %v3482_v20 }
 0x12c   :  { %1985 = vmatpush1.bf16.msra.mxu1 %v3480_v23 }
 0x12d   :  { %1986 = vmatprep.subr.bf16.mxu1 %v3485_v24  ;;  %v3573_v24 = vld [vmem:[#allocation5 + $0x100] ss:$8 sps:$4 sm:$0xff]  }
 0x130   :  { %1987 = vmatpush1.bf16.msra.mxu1 %v3483_v27  ;;  %v3578_v27 = vld [vmem:[#allocation5 + $0x114] ss:$8 sps:$4 sm:$0xff]  }
 0x131   :  { %1988 = vmatprep.subr.bf16.mxu1 %v3488_v28  ;;  %v3621_v28 = vld [vmem:[%s3923_s5 + $0x40] sm:$0xff]  }
 0x134   :  { %1989 = vmatpush1.bf16.msra.mxu1 %v3486_v29  ;;  %v3622_v29 = vld [vmem:[%s3923_s5] sm:$0xff]  }
 0x135   :  { %1990 = vmatprep.subr.bf16.mxu1 %v3491_v8  ;;  %v3623_v8 = vld [vmem:[%s3923_s5 + $0x48] sm:$0xff]  }
 0x138   :  { %1991 = vmatpush1.bf16.msra.mxu1 %v3489_v30  ;;  %v3576_v30 = vld [vmem:[#allocation5 + $0x110] ss:$8 sps:$4 sm:$0xff]  }
 0x139   :  { %1992 = vmatprep.subr.bf16.mxu1 %v3494_v31  ;;  %v3624_v31 = vld [vmem:[%s3923_s5 + $0x8] sm:$0xff]  }
 0x13a   :  { %v3822_v25 = vpop.f32.mrb[0].mxu1 }
 0x13b   :  { %v3824_v33 = vpop.f32.mrb[1].mxu1 }
 0x13c   :  { %v3826_v9 = vpop.f32.mrb[2].mxu1  ;;  %1993 = vmatpush1.bf16.msra.mxu1 %v3492_v16  ;;  %v3581_v16 = vld [vmem:[#allocation5 + $0x124] ss:$8 sps:$4 sm:$0xff]  }
 0x13d   :  { %v3828_v35 = vpop.f32.mrb[3].mxu1  ;;  %1994 = vmatprep.subr.bf16.mxu1 %v3497_v21  ;;  %v3625_v21 = vld [vmem:[%s3923_s5 + $0x50] sm:$0xff]  }
 0x140   :  { %1995 = vmatpush1.bf16.msra.mxu1 %v3495_v34  ;;  %v3628_v34 = vld [vmem:[%s3923_s5 + $0x18] sm:$0xff]  }
 0x141   :  { %1996 = vmatprep.subr.bf16.mxu1 %v3500_v36  ;;  %v3629_v36 = vld [vmem:[%s3923_s5 + $0x60] sm:$0xff]  }
 0x144   :  { %1997 = vmatpush1.bf16.msra.mxu1 %v3498_v37  ;;  %v3590_v37 = vld [vmem:[#allocation5 + $0x154] ss:$8 sps:$4 sm:$0xff]  }
 0x145   :  { %1998 = vmatprep.subr.bf16.mxu1 %v3503_v39  ;;  %v3631_v39 = vld [vmem:[%s3923_s5 + $0x68] sm:$0xff]  }
 0x148   :  { %1999 = vmatpush1.bf16.msra.mxu1 %v3501_v42  ;;  %v3591_v42 = vld [vmem:[#allocation5 + $0x160] ss:$8 sps:$4 sm:$0xff]  }
 0x149   :  { %2000 = vmatprep.subr.bf16.mxu1 %v3506_v43  ;;  %v3596_v43 = vld [vmem:[#allocation5 + $0x174] ss:$8 sps:$4 sm:$0xff]  }
 0x14c   :  { %2001 = vmatpush1.bf16.msra.mxu1 %v3504_v45  ;;  %v3599_v45 = vld [vmem:[#allocation5 + $0x184] ss:$8 sps:$4 sm:$0xff]  }
 0x14d   :  { %2002 = vmatprep.subr.bf16.mxu1 %v3509_v46  ;;  %v3597_v46 = vld [vmem:[#allocation5 + $0x180] ss:$8 sps:$4 sm:$0xff]  }
 0x150   :  { %2003 = vmatpush1.bf16.msra.mxu1 %v3507_v47  ;;  %v3602_v47 = vld [vmem:[#allocation5 + $0x194] ss:$8 sps:$4 sm:$0xff]  }
 0x151   :  { %2004 = vmatprep.subr.bf16.mxu1 %v3512_v48  ;;  %v3600_v48 = vld [vmem:[#allocation5 + $0x190] ss:$8 sps:$4 sm:$0xff]  }
 0x154   :  { %2005 = vmatpush1.bf16.msra.mxu1 %v3510_v49  ;;  %v3605_v49 = vld [vmem:[#allocation5 + $0x1a4] ss:$8 sps:$4 sm:$0xff]  }
 0x155   :  { %2006 = vmatprep.subr.bf16.mxu1 %v3515_v50  ;;  %v3603_v50 = vld [vmem:[#allocation5 + $0x1a0] ss:$8 sps:$4 sm:$0xff]  }
 0x158   :  { %2007 = vmatpush1.bf16.msra.mxu1 %v3513_v51  ;;  %v3608_v51 = vld [vmem:[#allocation5 + $0x1b4] ss:$8 sps:$4 sm:$0xff]  }
 0x159   :  { %2008 = vmatprep.subr.bf16.mxu1 %v3518_v52  ;;  %v3606_v52 = vld [vmem:[#allocation5 + $0x1b0] ss:$8 sps:$4 sm:$0xff]  }
 0x15c   :  { %2009 = vmatpush1.bf16.msra.mxu1 %v3516_v53  ;;  %v3611_v53 = vld [vmem:[#allocation5 + $0x1c4] ss:$8 sps:$4 sm:$0xff]  }
 0x15d   :  { %2010 = vmatprep.subr.bf16.mxu1 %v3521_v54  ;;  %v3609_v54 = vld [vmem:[#allocation5 + $0x1c0] ss:$8 sps:$4 sm:$0xff]  }
 0x160   :  { %2011 = vmatpush1.bf16.msra.mxu1 %v3519_v56  ;;  %v3614_v56 = vld [vmem:[#allocation5 + $0x1d4] ss:$8 sps:$4 sm:$0xff]  }
 0x161   :  { %2012 = vmatprep.subr.bf16.mxu1 %v3524_v57  ;;  %v3612_v57 = vld [vmem:[#allocation5 + $0x1d0] ss:$8 sps:$4 sm:$0xff]  }
 0x164   :  { %2013 = vmatpush1.bf16.msra.mxu1 %v3522_v58  ;;  %v3617_v58 = vld [vmem:[#allocation5 + $0x1e4] ss:$8 sps:$4 sm:$0xff]  }
 0x165   :  { %3081 = vmatprep.subr.bf16.mxu1 %v3621_v28  ;;  %v3635_v28 = vld [vmem:[%s3923_s5 + $0x78] sm:$0xff]  }
 0x167   :  { %2015 = vmatmul.mubr.bf16.vlgmr.msra.gmra.mrb[4].mxu1 %v3815_v26  ;;  %v68_v26 = vrot.slane %v3837_v62, %v67_v63 }
 0x168   :  { %3082 = vmatpush3.bf16.msra.mxu1 %v3622_v29  ;;  %v3636_v29 = vld [vmem:[%s3923_s5 + $0x38] sm:$0xff]  }
 0x169   :  { %3083 = vmatprep.subr.bf16.mxu1 %v3623_v8  ;;  %v2128_v8 = vld [vmem:[%s3922_s4] sm:$0x3] }
 0x16c   :  { %3084 = vmatpush3.bf16.msra.mxu1 %v3624_v31  ;;  %v2137_v31 = vrot.slane %v2128_v8, %v67_v63 }
 0x16d   :  { %3085 = vmatprep.subr.bf16.mxu1 %v3625_v21 }
 0x1bb   :  { %v1844_v1 = vpop.f32.mrb[0].mxu0 }
 0x1bc   :  { %v3103_v2 = vadd.f32 %v1844_v1, %v3822_v25  ;;  %v1846_v3 = vpop.f32.mrb[1].mxu0  ;;  %v3626_v25 = vld [vmem:[%s3923_s5 + $0x10] sm:$0xff]  }
 0x1bd   :  { %v3104_v4 = vadd.f32 %v1846_v3, %v3824_v33  ;;  %v1848_v5 = vpop.f32.mrb[2].mxu0  ;;  %v3627_v33 = vld [vmem:[%s3923_s5 + $0x58] sm:$0xff]   ;;  %3086 = vmatpush3.bf16.msra.mxu1 %v3626_v25 }
 0x1be   :  { %v2025_v6 = vadd.f32 %v3103_v2, %v64_v0  ;;  %v3105_v7 = vadd.f32 %v1848_v5, %v3826_v9  ;;  %v1850_v10 = vpop.f32.mrb[3].mxu0  ;;  %v3582_v9 = vld [vmem:[#allocation5 + $0x130] ss:$8 sps:$4 sm:$0xff]   ;;  %3087 = vmatprep.subr.bf16.mxu1 %v3627_v33  ;;  %v75_v2 = vsub.s32 3, %v3831_v60 }
 0x1bf   :  { %v2026_v11 = vadd.f32 %v3104_v4, %v68_v26  ;;  %v3106_v12 = vadd.f32 %v1850_v10, %v3828_v35  ;;  %v3587_v35 = vld [vmem:[#allocation5 + $0x144] ss:$8 sps:$4 sm:$0xff]   ;;  %v3618_v1 = vld [vmem:[#allocation5 + $0x1f0] ss:$8 sps:$4 sm:$0xff]  }
 0x1c0   :  { %v2029_v13 = vadd.f32 %v3105_v7, %v64_v0  ;;  %v2052_v15 = vmax.f32 %v2025_v6, 0.0  ;;  %v3620_v0 = vld [vmem:[#allocation5 + $0x1f4] ss:$8 sps:$4 sm:$0xff]   ;;  %v76_v4 = vrot.slane %v3837_v62, %v75_v2 }
 0x1c1   :  { %v2030_v14 = vadd.f32 %v3106_v12, %v68_v26  ;;  %v2053_v18 = vmax.f32 %v2026_v11, 0.0  ;;  %3088 = vmatpush3.bf16.msra.mxu1 %v3628_v34  ;;  %v71_v26 = vsub.s32 2, %v3831_v60  ;;  %v3064_v60 = vld [vmem:[%s3924_s6] ss:$0 sm:$0xff] }
 0x1c2   :  { %v2056_v17 = vmax.f32 %v2029_v13, 0.0  ;;  %3089 = vmatprep.subr.bf16.mxu1 %v3629_v36 }
 0x1c3   :  { %v2057_v19 = vmax.f32 %v2030_v14, 0.0  ;;  %v72_v3 = vrot.slane %v3837_v62, %v71_v26  ;;  %v3632_v62 = vld [vmem:[%s3923_s5 + $0x28] sm:$0xff]  }
 0x1c4   :  { %v2060_v20 = vpack.c.bf16 %v2056_v17, %v2052_v15 }
 0x1c5   :  { %v2061_v23 = vpack.c.bf16 %v2057_v19, %v2053_v18  ;;  %3090 = vmatpush3.bf16.msra.mxu1 %v3630_v55 }
 0x1c6   :  { %3091 = vmatprep.subr.bf16.mxu1 %v3631_v39 }
 0x1c7   :  { %2492 = vmatprep.mubr.bf16.mxu0 %v2061_v23 }
 0x1c8   :  { %2493 = vmatmul.mubr.bf16.vlgmr.msra.gmra.mrb[4].mxu0 %v2060_v20 }
 0x1c9   :  { %2504 = vmatpush1.bf16.msra.mxu0 %v3573_v24  ;;  %3092 = vmatpush3.bf16.msra.mxu1 %v3632_v62  ;;  %v3633_v24 = vld [vmem:[%s3923_s5 + $0x70] sm:$0xff]  }
 0x1ca   :  { %2505 = vmatprep.subr.bf16.mxu0 %v3578_v27  ;;  %v3634_v27 = vld [vmem:[%s3923_s5 + $0x30] sm:$0xff]   ;;  %3093 = vmatprep.subr.bf16.mxu1 %v3633_v24 }
 0x1cd   :  { %2506 = vmatpush1.bf16.msra.mxu0 %v3576_v30  ;;  %3094 = vmatpush3.bf16.msra.mxu1 %v3634_v27  ;;  %v2133_v30 = vrot.slane %v2128_v8, %v63_v61 }
 0x1ce   :  { %2507 = vmatprep.subr.bf16.mxu0 %v3581_v16  ;;  %3095 = vmatprep.subr.bf16.mxu1 %v3635_v28 }
 0x1d1   :  { %2508 = vmatpush1.bf16.msra.mxu0 %v3579_v22  ;;  %3096 = vmatpush3.bf16.msra.mxu1 %v3636_v29 }
 0x1d2   :  { %2509 = vmatprep.subr.bf16.mxu0 %v3584_v32 }
 0x1d5   :  { %2510 = vmatpush1.bf16.msra.mxu0 %v3582_v9 }
 0x1d6   :  { %2511 = vmatprep.subr.bf16.mxu0 %v3587_v35 }
 0x1d9   :  { %2512 = vmatpush1.bf16.msra.mxu0 %v3585_v38 }
 0x1da   :  { %2513 = vmatprep.subr.bf16.mxu0 %v3590_v37 }
 0x1dd   :  { %2514 = vmatpush1.bf16.msra.mxu0 %v3588_v40 }
 0x1de   :  { %2515 = vmatprep.subr.bf16.mxu0 %v3593_v41 }
 0x1e1   :  { %2516 = vmatpush1.bf16.msra.mxu0 %v3591_v42 }
 0x1e2   :  { %2517 = vmatprep.subr.bf16.mxu0 %v3596_v43 }
 0x1e5   :  { %2518 = vmatpush1.bf16.msra.mxu0 %v3594_v44 }
 0x1e6   :  { %2519 = vmatprep.subr.bf16.mxu0 %v3599_v45 }
 0x1e9   :  { %2520 = vmatpush1.bf16.msra.mxu0 %v3597_v46 }
 0x1ea   :  { %2521 = vmatprep.subr.bf16.mxu0 %v3602_v47 }
 0x1ed   :  { %2522 = vmatpush1.bf16.msra.mxu0 %v3600_v48 }
 0x1ee   :  { %2523 = vmatprep.subr.bf16.mxu0 %v3605_v49 }
 0x1f1   :  { %2524 = vmatpush1.bf16.msra.mxu0 %v3603_v50 }
 0x1f2   :  { %2525 = vmatprep.subr.bf16.mxu0 %v3608_v51 }
 0x1f5   :  { %2526 = vmatpush1.bf16.msra.mxu0 %v3606_v52 }
 0x1f6   :  { %2527 = vmatprep.subr.bf16.mxu0 %v3611_v53 }
 0x1f9   :  { %2528 = vmatpush1.bf16.msra.mxu0 %v3609_v54 }
 0x1fa   :  { %2529 = vmatprep.subr.bf16.mxu0 %v3614_v56 }
 0x1fd   :  { %2530 = vmatpush1.bf16.msra.mxu0 %v3612_v57 }
 0x1fe   :  { %2531 = vmatprep.subr.bf16.mxu0 %v3617_v58 }
 0x201   :  { %2532 = vmatpush1.bf16.msra.mxu0 %v3615_v59 }
 0x202   :  { %2533 = vmatprep.subr.bf16.mxu0 %v3620_v0 }
 0x205   :  { %2534 = vmatpush1.bf16.msra.mxu0 %v3618_v1 }
 0x23a   :  { %v2016_v5 = vpop.f32.mrb[4].mxu1 }
 0x23b   :  { %v2027_v6 = vadd.f32 %v2016_v5, %v72_v3  ;;  %v2018_v7 = vpop.f32.mrb[5].mxu1 }
 0x23c   :  { %v2028_v10 = vadd.f32 %v2018_v7, %v76_v4  ;;  %v2020_v11 = vpop.f32.mrb[6].mxu1 }
 0x23d   :  { %v2031_v12 = vadd.f32 %v2020_v11, %v72_v3  ;;  %v2022_v13 = vpop.f32.mrb[7].mxu1  ;;  %v2054_v15 = vmax.f32 %v2027_v6, 0.0 }
 0x23e   :  { %v2032_v14 = vadd.f32 %v2022_v13, %v76_v4  ;;  %v2055_v18 = vmax.f32 %v2028_v10, 0.0 }
 0x23f   :  { %v2058_v17 = vmax.f32 %v2031_v12, 0.0 }
 0x240   :  { %v2059_v19 = vmax.f32 %v2032_v14, 0.0 }
 0x241   :  { %v2062_v20 = vpack.c.bf16 %v2058_v17, %v2054_v15 }
 0x242   :  { %v2063_v23 = vpack.c.bf16 %v2059_v19, %v2055_v18 }
 0x244   :  { %2535 = vmatprep.mubr.bf16.mxu0 %v2063_v23 }
 0x245   :  { %2536 = vmatmul.mubr.bf16.vlgmr.msra.gmra.mrb[4].mxu0 %v2062_v20 }
 0x318   :  { %v2537_v16 = vpop.f32.mrb[4].mxu0 }
 0x319   :  { %v3107_v21 = vadd.f32 %v2537_v16, %v2133_v30  ;;  %v2539_v22 = vpop.f32.mrb[5].mxu0 }
 0x31a   :  { %v3108_v25 = vadd.f32 %v2539_v22, %v2137_v31  ;;  %v2541_v32 = vpop.f32.mrb[6].mxu0 }
 0x31b   :  { %v3109_v33 = vadd.f32 %v2541_v32, %v2133_v30  ;;  %v2543_v9 = vpop.f32.mrb[7].mxu0  ;;  %v2546_v35 = vmax.f32 %v3107_v21, 0.0 }
 0x31c   :  { %v3110_v34 = vadd.f32 %v2543_v9, %v2137_v31  ;;  %v2547_v38 = vmax.f32 %v3108_v25, 0.0 }
 0x31d   :  { %v2548_v36 = vmax.f32 %v3109_v33, 0.0 }
 0x31e   :  { %v2549_v55 = vmax.f32 %v3110_v34, 0.0 }
 0x31f   :  { %v2550_v37 = vpack.c.bf16 %v2548_v36, %v2546_v35 }
 0x320   :  { %v2551_v39 = vpack.c.bf16 %v2549_v55, %v2547_v38 }
 0x322   :  { %2719 = vmatprep.mubr.bf16.mxu1 %v2551_v39 }
 0x323   :  { %2720 = vmatmul.mubr.bf16.vlgmr.msra.gmra.mrb[8].mxu1 %v2550_v37 }
 0x3f6   :  { %v3097_v61 = vpop.f32.mrb[8].mxu1 }
 0x3f7   :  { %v3098_v63 = vpop.f32.mrb[9].mxu1 }
 0x3f8   :  { %v3099_v40 = vadd.f32 %v3098_v63, %v3097_v61  ;;  %v3100_v41 = vpop.f32.mrb[10].mxu1 }
 0x3f9   :  { %v3101_v42 = vpop.f32.mrb[11].mxu1 }
 0x3fa   :  { %v2722_v43 = vadd.f32 %v3099_v40, %v3064_v60  ;;  %v3102_v44 = vadd.f32 %v3101_v42, %v3100_v41 }
 0x3fc   :  { %2728 = vst [vmem:[%s3925_s7] sm:$0xff] %v2722_v43  ;;  %v2725_v45 = vadd.f32 %v3102_v44, %v3064_v60 }
 0x3fe   :  { %2729 = vst [vmem:[%s3925_s7 + $0x8] sm:$0xff] %v2725_v45 }
 0x3ff   :  { %2734 = vsyncpa [#allocation4], 1 }
 0x400   :  { %2735 = vsyncpa [#allocation6], 1 }

</bundles_post_ra>
